<compile_context>
chip_gen: v6e
topology: v6e:2x2x1
jax: 0.10.0
libtpu: 0.0.40
codegen_flags: <defaults>
</compile_context>

<pallas_src>
import functools

import jax
import jax.numpy as jnp
from jax.experimental import pallas as pl
from jax.experimental.pallas import tpu as pltpu

BN_EPS = 1e-5


# ----------------------------- math helpers (trace-time, used in-kernel) ----
def _relu(x):
    return jnp.maximum(x, 0.0)


def _hswish(x):
    return x * jnp.clip(x + 3.0, 0.0, 6.0) * (1.0 / 6.0)


def _hsigmoid(x):
    return jnp.clip(x + 3.0, 0.0, 6.0) * (1.0 / 6.0)


# --------------------------------- kernel -----------------------------------
def mobile_bottleneck_kernel(
    x_ref, w1_ref, g1_ref, b1_ref, wm_ref, sel_ref, selT_ref, g2_ref, b2_ref,
    wse1_ref, wse2_ref, w3_ref, g3_ref, b3_ref, o_ref,
    *, kernel_size, width, batch, cin, nl, use_se, use_res,
):
    nlin = _hswish if nl == "HS" else _relu
    K = kernel_size
    pad = (K - 1) // 2
    B = batch
    L = x_ref.shape[1]          # H*W (spatial, lane axis)
    BL = B * L
    inv_bl = 1.0 / BL

    # ---- channel-major view of the input: (Cin, B*L), lane index p = b*L + l ----
    x = x_ref[...].astype(jnp.float32)                                   # (B*Cin, L)
    x_cx = jnp.concatenate([x[b * cin:(b + 1) * cin, :] for b in range(B)], axis=1)

    # ---- 1x1 expand conv: ONE (E,Cin)x(Cin,B*L) MXU matmul ----
    h = jnp.dot(w1_ref[...], x_cx, preferred_element_type=jnp.float32)   # (E, B*L)

    # ---- BN1 (train-mode batch stats over B*H*W) folded to scale/bias + nlin ----
    # NOTE: E[x^2]-E[x]^2 single-pass form; switch to the centered form if
    # activations are ever carried in bf16 (see correctness feedback).
    m1 = jnp.sum(h, axis=1, keepdims=True) * inv_bl                      # (E,1)
    q1 = jnp.sum(h * h, axis=1, keepdims=True) * inv_bl
    scale1 = g1_ref[...] * jax.lax.rsqrt(q1 - m1 * m1 + BN_EPS)
    shift1 = b1_ref[...] - m1 * scale1
    h = nlin(h * scale1 + shift1)

    # ---- depthwise KxK conv, stride 1, "same" zero padding ----
    # Lane rotation of the full (E, B*L) slab; the pre-fused (weight*mask)
    # multiplier zeroes every tap that falls outside its own image, which also
    # covers row- and batch-boundary wrap-around of the rotation.
    center = (K * K) // 2
    acc = h * wm_ref[center]                         # center tap: no roll
    for t in range(K * K):
        if t == center:
            continue
        s = (t // K - pad) * width + (t % K - pad)   # flat tap offset
        rolled = pltpu.roll(h, (-s) % BL, 1)         # rolled[p] = h[(p+s) mod BL]
        acc = acc + rolled * wm_ref[t]

    # ---- BN2 + SE fused (linearity of the mean) ----
    # Per-(e,b) segment sums via one MXU matmul against the selector matrix.
    seg_sum = jnp.dot(acc, selT_ref[...], preferred_element_type=jnp.float32)       # (E,B)
    seg_sq = jnp.dot(acc * acc, selT_ref[...], preferred_element_type=jnp.float32)  # (E,B)
    m2 = jnp.sum(seg_sum, axis=1, keepdims=True) * inv_bl                           # (E,1)
    q2 = jnp.sum(seg_sq, axis=1, keepdims=True) * inv_bl
    scale2 = g2_ref[...] * jax.lax.rsqrt(q2 - m2 * m2 + BN_EPS)
    shift2 = b2_ref[...] - m2 * scale2

    if use_se:
        # SE pooled vector derived from the same sums: mean_L(BN2(acc)).
        pooled = seg_sum * (1.0 / L) * scale2 + shift2                               # (E,B)
        z = _relu(jnp.dot(wse1_ref[...], pooled, preferred_element_type=jnp.float32))
        se = _hsigmoid(jnp.dot(wse2_ref[...], z, preferred_element_type=jnp.float32))  # (E,B)
        cs = scale2 * se                                                              # (E,B)
        cb = shift2 * se
        # Broadcast per-(e,b) scale/bias over L lanes with one tiny MXU matmul each.
        cs_bl = jnp.dot(cs, sel_ref[...], preferred_element_type=jnp.float32)         # (E,B*L)
        cb_bl = jnp.dot(cb, sel_ref[...], preferred_element_type=jnp.float32)
        h3 = nlin(acc * cs_bl + cb_bl)          # BN2 + SE + nonlinearity in one pass
    else:
        h3 = nlin(acc * scale2 + shift2)

    # ---- 1x1 project conv: ONE (Cout,E)x(E,B*L) MXU matmul ----
    out = jnp.dot(w3_ref[...], h3, preferred_element_type=jnp.float32)   # (Cout, B*L)

    # ---- BN3 + residual fused epilogue ----
    m3 = jnp.sum(out, axis=1, keepdims=True) * inv_bl
    q3 = jnp.sum(out * out, axis=1, keepdims=True) * inv_bl
    scale3 = g3_ref[...] * jax.lax.rsqrt(q3 - m3 * m3 + BN_EPS)
    shift3 = b3_ref[...] - m3 * scale3
    if use_res:
        out = out * scale3 + shift3 + x_cx
    else:
        out = out * scale3 + shift3

    # Back to (B*Cout, L) rows -> one dense, lane-wide store; wrapper reshape
    # to NCHW is a free contiguous reshape.
    rows = jnp.concatenate([out[:, b * L:(b + 1) * L] for b in range(B)], axis=0)
    o_ref[...] = rows.astype(o_ref.dtype)


# --------------------------------- wrapper ----------------------------------
def _make_tap_masks(H, W, K):
    # (K*K, L) float32 validity masks for each depthwise tap (zero padding).
    pad = (K - 1) // 2
    idx = jnp.arange(H * W, dtype=jnp.int32)
    ii = idx // W
    jj = idx % W
    rows = []
    for t in range(K * K):
        dh = t // K - pad
        dw = t % K - pad
        valid = (jj + dw >= 0) & (jj + dw < W) & (ii + dh >= 0) & (ii + dh < H)
        rows.append(valid.astype(jnp.float32))
    return jnp.stack(rows, axis=0)


def mobile_bottleneck(x_nchw, params, *, kernel_size, stride, nl, use_se):
    assert stride == 1, "only stride=1 supported by this kernel"
    B, Cin, H, W = x_nchw.shape
    K = kernel_size
    E = params["w1"].shape[0]
    Cout = params["w3"].shape[0]
    use_res = (stride == 1) and (Cin == Cout)
    L = H * W

    # NCHW consumed via a free contiguous reshape -> dense (B*Cin, L) slab.
    x = x_nchw.reshape(B * Cin, L)

    # Pre-fused depthwise multiplier: tap weight * boundary mask, tiled over B
    # on the lane axis.  (At production scale compute this per tap in-kernel.)
    mask_bl = jnp.tile(_make_tap_masks(H, W, K), (1, B))          # (K*K, B*L)
    wdw_te = params["wdw"].reshape(E, K * K).T                    # (K*K, E)
    wm = wdw_te[:, :, None] * mask_bl[:, None, :]                 # (K*K, E, B*L)

    # Batch-segment selector: sel[b, p] = 1 iff p // L == b.
    sel = jnp.repeat(jnp.eye(B, dtype=jnp.float32), L, axis=1)    # (B, B*L)
    selT = sel.T                                                  # (B*L, B)

    g1 = params["g1"].reshape(E, 1); b1 = params["b1"].reshape(E, 1)
    g2 = params["g2"].reshape(E, 1); b2 = params["b2"].reshape(E, 1)
    g3 = params["g3"].reshape(Cout, 1); b3 = params["b3"].reshape(Cout, 1)

    kern = functools.partial(
        mobile_bottleneck_kernel,
        kernel_size=K, width=W, batch=B, cin=Cin,
        nl=nl, use_se=use_se, use_res=use_res,
    )
    vmem = pl.BlockSpec(memory_space=pltpu.MemorySpace.VMEM)
    args = (
        x,
        params["w1"], g1, b1,
        wm, sel, selT, g2, b2,
        params["wse1"], params["wse2"],
        params["w3"], g3, b3,
    )
    # Size VMEM limit from the actual footprint (with headroom) instead of a
    # blanket 32 MiB.
    arg_bytes = sum(int(a.size) * 4 for a in args) + B * Cout * L * 4
    vmem_limit = max(4 << 20, 4 * arg_bytes)

    out = pl.pallas_call(
        kern,
        out_shape=jax.ShapeDtypeStruct((B * Cout, L), x_nchw.dtype),
        in_specs=[vmem] * len(args),
        out_specs=vmem,
        compiler_params=pltpu.CompilerParams(vmem_limit_bytes=vmem_limit),
    )(*args)
    return out.reshape(B, Cout, H, W)            # free reshape back to NCHW


# ----------------------------- pure-JAX reference ----------------------------
def mobile_bottleneck_ref(x, params, *, kernel_size, stride, nl, use_se):
    # Independent NCHW reference using XLA convolutions (PyTorch semantics).
    nlin = _hswish if nl == "HS" else _relu
    prec = jax.lax.Precision.HIGHEST
    dn = ("NCHW", "OIHW", "NCHW")
    B, Cin, H, W = x.shape
    E = params["w1"].shape[0]
    Cout = params["w3"].shape[0]
    pad = (kernel_size - 1) // 2

    def bn(v, gamma, beta):
        mean = jnp.mean(v, axis=(0, 2, 3), keepdims=True)
        var = jnp.mean(jnp.square(v - mean), axis=(0, 2, 3), keepdims=True)
        g = gamma.reshape(1, -1, 1, 1)
        b = beta.reshape(1, -1, 1, 1)
        return (v - mean) * jax.lax.rsqrt(var + BN_EPS) * g + b

    h = jax.lax.conv_general_dilated(
        x, params["w1"].reshape(E, Cin, 1, 1), (1, 1), "VALID",
        dimension_numbers=dn, precision=prec)
    h = nlin(bn(h, params["g1"], params["b1"]))

    h = jax.lax.conv_general_dilated(
        h, params["wdw"].reshape(E, 1, kernel_size, kernel_size),
        (stride, stride), [(pad, pad), (pad, pad)],
        dimension_numbers=dn, feature_group_count=E, precision=prec)
    h = bn(h, params["g2"], params["b2"])

    if use_se:
        y = jnp.mean(h, axis=(2, 3))                                    # (B, E)
        y = _relu(jnp.dot(y, params["wse1"].T, precision=prec))         # (B, E//4)
        y = _hsigmoid(jnp.dot(y, params["wse2"].T, precision=prec))     # (B, E)
        h = h * y[:, :, None, None]
    h = nlin(h)

    out = jax.lax.conv_general_dilated(
        h, params["w3"].reshape(Cout, E, 1, 1), (1, 1), "VALID",
        dimension_numbers=dn, precision=prec)
    out = bn(out, params["g3"], params["b3"])
    if stride == 1 and Cin == Cout:
        out = out + x
    return out


# --------------------------------- main --------------------------------------
if __name__ == "__main__":
    # MobileBottleneck(inp=4, oup=4, kernel=3, stride=1, exp=16, se=True, nl='HS')
    inp, oup, kernel_size, stride, exp = 4, 4, 3, 1, 16
    use_se, nl = True, "HS"
    B, H, W = 2, 16, 16

    key = jax.random.PRNGKey(0)
    ks = jax.random.split(key, 10)

    x = jax.random.normal(ks[0], (B, inp, H, W), dtype=jnp.float32)  # NCHW like PyTorch

    # Parameters stored in PyTorch-native layouts.
    params = {
        # pointwise expand: Conv2d(inp, exp, 1).weight squeezed -> (exp, inp)
        "w1": 0.2 * jax.random.normal(ks[1], (exp, inp), jnp.float32),
        "g1": 1.0 + 0.1 * jax.random.normal(ks[2], (exp,), jnp.float32),
        "b1": 0.1 * jax.random.normal(ks[3], (exp,), jnp.float32),
        # depthwise: Conv2d(exp, exp, K, groups=exp).weight squeezed -> (exp, K, K)
        "wdw": 0.2 * jax.random.normal(ks[4], (exp, kernel_size, kernel_size), jnp.float32),
        "g2": 1.0 + 0.1 * jax.random.normal(ks[5], (exp,), jnp.float32),
        "b2": 0.1 * jax.random.normal(ks[6], (exp,), jnp.float32),
        # SE: Linear(exp, exp//4).weight -> (exp//4, exp); Linear(exp//4, exp).weight -> (exp, exp//4)
        "wse1": 0.2 * jax.random.normal(ks[7], (exp // 4, exp), jnp.float32),
        "wse2": 0.2 * jax.random.normal(ks[8], (exp, exp // 4), jnp.float32),
        # pointwise project: Conv2d(exp, oup, 1).weight squeezed -> (oup, exp)
        "w3": 0.2 * jax.random.normal(ks[9], (oup, exp), jnp.float32),
        "g3": 1.0 + 0.1 * jax.random.normal(ks[2], (oup,), jnp.float32),
        "b3": 0.1 * jax.random.normal(ks[3], (oup,), jnp.float32),
    }

    out = mobile_bottleneck(x, params, kernel_size=kernel_size, stride=stride,
                            nl=nl, use_se=use_se)
    out = jax.block_until_ready(out)

    ref = mobile_bottleneck_ref(x, params, kernel_size=kernel_size, stride=stride,
                                nl=nl, use_se=use_se)
    assert out.shape == (B, oup, H, W), out.shape
    max_err = float(jnp.max(jnp.abs(out - ref)))
    assert jnp.allclose(out, ref, rtol=2e-3, atol=2e-3), max_err

    print("KERNEL_OK")
</pallas_src>

<mosaic_0001>
module attributes {stable_mosaic.version = 11 : i64} {
  func.func @mobile_bottleneck_kernel(%arg0: memref<8x256xf32, #tpu.memory_space<vmem>>, %arg1: memref<16x4xf32, #tpu.memory_space<vmem>>, %arg2: memref<16x1xf32, #tpu.memory_space<vmem>>, %arg3: memref<16x1xf32, #tpu.memory_space<vmem>>, %arg4: memref<9x16x512xf32, #tpu.memory_space<vmem>>, %arg5: memref<2x512xf32, #tpu.memory_space<vmem>>, %arg6: memref<512x2xf32, #tpu.memory_space<vmem>>, %arg7: memref<16x1xf32, #tpu.memory_space<vmem>>, %arg8: memref<16x1xf32, #tpu.memory_space<vmem>>, %arg9: memref<4x16xf32, #tpu.memory_space<vmem>>, %arg10: memref<16x4xf32, #tpu.memory_space<vmem>>, %arg11: memref<4x16xf32, #tpu.memory_space<vmem>>, %arg12: memref<4x1xf32, #tpu.memory_space<vmem>>, %arg13: memref<4x1xf32, #tpu.memory_space<vmem>>, %arg14: memref<8x256xf32, #tpu.memory_space<vmem>>) attributes {dimension_semantics = [], scalar_prefetch = 0 : i64, scratch_operands = 0 : i64, tpu.core_type = #tpu.core_type<tc>} {
    %c0 = arith.constant 0 : index
    %c0_0 = arith.constant 0 : index
    %0 = vector.load %arg0[%c0, %c0_0] : memref<8x256xf32, #tpu.memory_space<vmem>>, vector<8x256xf32>
    %1 = vector.extract_strided_slice %0 {offsets = [0, 0], sizes = [4, 256], strides = [1, 1]} : vector<8x256xf32> to vector<4x256xf32>
    %2 = vector.extract_strided_slice %0 {offsets = [4, 0], sizes = [4, 256], strides = [1, 1]} : vector<8x256xf32> to vector<4x256xf32>
    %3 = tpu.concatenate %1, %2 in 1 : vector<4x256xf32>, vector<4x256xf32> -> vector<4x512xf32>
    %c0_1 = arith.constant 0 : index
    %c0_2 = arith.constant 0 : index
    %4 = vector.load %arg1[%c0_1, %c0_2] : memref<16x4xf32, #tpu.memory_space<vmem>>, vector<16x4xf32>
    %cst = arith.constant dense<0.000000e+00> : vector<16x512xf32>
    %5 = tpu.matmul %4, %3, %cst {dimension_numbers = #tpu.dot_dimension_numbers<[1], [0], [0], [1], [0, 0, 1, 1], [], []>} : vector<16x4xf32>, vector<4x512xf32>, vector<16x512xf32> -> vector<16x512xf32>
    %cst_3 = arith.constant dense<0.000000e+00> : vector<16xf32>
    %6 = vector.multi_reduction <add>, %5, %cst_3 [1] : vector<16x512xf32> to vector<16xf32>
    %7 = vector.shape_cast %6 : vector<16xf32> to vector<16x1xf32>
    %cst_4 = arith.constant 0.001953125 : f32
    %8 = vector.broadcast %cst_4 : f32 to vector<16x1xf32>
    %9 = arith.mulf %7, %8 : vector<16x1xf32>
    %10 = arith.mulf %5, %5 : vector<16x512xf32>
    %cst_5 = arith.constant dense<0.000000e+00> : vector<16xf32>
    %11 = vector.multi_reduction <add>, %10, %cst_5 [1] : vector<16x512xf32> to vector<16xf32>
    %12 = vector.shape_cast %11 : vector<16xf32> to vector<16x1xf32>
    %cst_6 = arith.constant 0.001953125 : f32
    %13 = vector.broadcast %cst_6 : f32 to vector<16x1xf32>
    %14 = arith.mulf %12, %13 : vector<16x1xf32>
    %c0_7 = arith.constant 0 : index
    %c0_8 = arith.constant 0 : index
    %15 = vector.load %arg2[%c0_7, %c0_8] : memref<16x1xf32, #tpu.memory_space<vmem>>, vector<16x1xf32>
    %16 = arith.mulf %9, %9 : vector<16x1xf32>
    %17 = arith.subf %14, %16 : vector<16x1xf32>
    %cst_9 = arith.constant 9.99999974E-6 : f32
    %18 = vector.broadcast %cst_9 : f32 to vector<16x1xf32>
    %19 = arith.addf %17, %18 : vector<16x1xf32>
    %20 = math.rsqrt %19 : vector<16x1xf32>
    %21 = arith.mulf %15, %20 : vector<16x1xf32>
    %c0_10 = arith.constant 0 : index
    %c0_11 = arith.constant 0 : index
    %22 = vector.load %arg3[%c0_10, %c0_11] : memref<16x1xf32, #tpu.memory_space<vmem>>, vector<16x1xf32>
    %23 = arith.mulf %9, %21 : vector<16x1xf32>
    %24 = arith.subf %22, %23 : vector<16x1xf32>
    %25 = vector.broadcast %21 : vector<16x1xf32> to vector<16x512xf32>
    %26 = arith.mulf %5, %25 : vector<16x512xf32>
    %27 = vector.broadcast %24 : vector<16x1xf32> to vector<16x512xf32>
    %28 = arith.addf %26, %27 : vector<16x512xf32>
    %cst_12 = arith.constant 3.000000e+00 : f32
    %29 = vector.broadcast %cst_12 : f32 to vector<16x512xf32>
    %30 = arith.addf %28, %29 : vector<16x512xf32>
    %cst_13 = arith.constant 0.000000e+00 : f32
    %cst_14 = arith.constant 6.000000e+00 : f32
    %31 = vector.broadcast %cst_13 : f32 to vector<16x512xf32>
    %32 = arith.maximumf %31, %30 : vector<16x512xf32>
    %33 = vector.broadcast %cst_14 : f32 to vector<16x512xf32>
    %34 = arith.minimumf %33, %32 : vector<16x512xf32>
    %35 = arith.mulf %28, %34 : vector<16x512xf32>
    %cst_15 = arith.constant 0.166666672 : f32
    %36 = vector.broadcast %cst_15 : f32 to vector<16x512xf32>
    %37 = arith.mulf %35, %36 : vector<16x512xf32>
    %c4 = arith.constant 4 : index
    %c0_16 = arith.constant 0 : index
    %c0_17 = arith.constant 0 : index
    %38 = vector.load %arg4[%c4, %c0_16, %c0_17] : memref<9x16x512xf32, #tpu.memory_space<vmem>>, vector<1x16x512xf32>
    %39 = vector.shape_cast %38 : vector<1x16x512xf32> to vector<16x512xf32>
    %40 = arith.mulf %37, %39 : vector<16x512xf32>
    %c17_i32 = arith.constant 17 : i32
    %41 = tpu.dynamic_rotate %37 by %c17_i32 dim 1 : vector<16x512xf32>, i32 -> vector<16x512xf32>
    %c0_18 = arith.constant 0 : index
    %c0_19 = arith.constant 0 : index
    %c0_20 = arith.constant 0 : index
    %42 = vector.load %arg4[%c0_18, %c0_19, %c0_20] : memref<9x16x512xf32, #tpu.memory_space<vmem>>, vector<1x16x512xf32>
    %43 = vector.shape_cast %42 : vector<1x16x512xf32> to vector<16x512xf32>
    %44 = arith.mulf %41, %43 : vector<16x512xf32>
    %45 = arith.addf %40, %44 : vector<16x512xf32>
    %c16_i32 = arith.constant 16 : i32
    %46 = tpu.dynamic_rotate %37 by %c16_i32 dim 1 : vector<16x512xf32>, i32 -> vector<16x512xf32>
    %c1 = arith.constant 1 : index
    %c0_21 = arith.constant 0 : index
    %c0_22 = arith.constant 0 : index
    %47 = vector.load %arg4[%c1, %c0_21, %c0_22] : memref<9x16x512xf32, #tpu.memory_space<vmem>>, vector<1x16x512xf32>
    %48 = vector.shape_cast %47 : vector<1x16x512xf32> to vector<16x512xf32>
    %49 = arith.mulf %46, %48 : vector<16x512xf32>
    %50 = arith.addf %45, %49 : vector<16x512xf32>
    %c15_i32 = arith.constant 15 : i32
    %51 = tpu.dynamic_rotate %37 by %c15_i32 dim 1 : vector<16x512xf32>, i32 -> vector<16x512xf32>
    %c2 = arith.constant 2 : index
    %c0_23 = arith.constant 0 : index
    %c0_24 = arith.constant 0 : index
    %52 = vector.load %arg4[%c2, %c0_23, %c0_24] : memref<9x16x512xf32, #tpu.memory_space<vmem>>, vector<1x16x512xf32>
    %53 = vector.shape_cast %52 : vector<1x16x512xf32> to vector<16x512xf32>
    %54 = arith.mulf %51, %53 : vector<16x512xf32>
    %55 = arith.addf %50, %54 : vector<16x512xf32>
    %c1_i32 = arith.constant 1 : i32
    %56 = tpu.dynamic_rotate %37 by %c1_i32 dim 1 : vector<16x512xf32>, i32 -> vector<16x512xf32>
    %c3 = arith.constant 3 : index
    %c0_25 = arith.constant 0 : index
    %c0_26 = arith.constant 0 : index
    %57 = vector.load %arg4[%c3, %c0_25, %c0_26] : memref<9x16x512xf32, #tpu.memory_space<vmem>>, vector<1x16x512xf32>
    %58 = vector.shape_cast %57 : vector<1x16x512xf32> to vector<16x512xf32>
    %59 = arith.mulf %56, %58 : vector<16x512xf32>
    %60 = arith.addf %55, %59 : vector<16x512xf32>
    %c511_i32 = arith.constant 511 : i32
    %61 = tpu.dynamic_rotate %37 by %c511_i32 dim 1 : vector<16x512xf32>, i32 -> vector<16x512xf32>
    %c5 = arith.constant 5 : index
    %c0_27 = arith.constant 0 : index
    %c0_28 = arith.constant 0 : index
    %62 = vector.load %arg4[%c5, %c0_27, %c0_28] : memref<9x16x512xf32, #tpu.memory_space<vmem>>, vector<1x16x512xf32>
    %63 = vector.shape_cast %62 : vector<1x16x512xf32> to vector<16x512xf32>
    %64 = arith.mulf %61, %63 : vector<16x512xf32>
    %65 = arith.addf %60, %64 : vector<16x512xf32>
    %c497_i32 = arith.constant 497 : i32
    %66 = tpu.dynamic_rotate %37 by %c497_i32 dim 1 : vector<16x512xf32>, i32 -> vector<16x512xf32>
    %c6 = arith.constant 6 : index
    %c0_29 = arith.constant 0 : index
    %c0_30 = arith.constant 0 : index
    %67 = vector.load %arg4[%c6, %c0_29, %c0_30] : memref<9x16x512xf32, #tpu.memory_space<vmem>>, vector<1x16x512xf32>
    %68 = vector.shape_cast %67 : vector<1x16x512xf32> to vector<16x512xf32>
    %69 = arith.mulf %66, %68 : vector<16x512xf32>
    %70 = arith.addf %65, %69 : vector<16x512xf32>
    %c496_i32 = arith.constant 496 : i32
    %71 = tpu.dynamic_rotate %37 by %c496_i32 dim 1 : vector<16x512xf32>, i32 -> vector<16x512xf32>
    %c7 = arith.constant 7 : index
    %c0_31 = arith.constant 0 : index
    %c0_32 = arith.constant 0 : index
    %72 = vector.load %arg4[%c7, %c0_31, %c0_32] : memref<9x16x512xf32, #tpu.memory_space<vmem>>, vector<1x16x512xf32>
    %73 = vector.shape_cast %72 : vector<1x16x512xf32> to vector<16x512xf32>
    %74 = arith.mulf %71, %73 : vector<16x512xf32>
    %75 = arith.addf %70, %74 : vector<16x512xf32>
    %c495_i32 = arith.constant 495 : i32
    %76 = tpu.dynamic_rotate %37 by %c495_i32 dim 1 : vector<16x512xf32>, i32 -> vector<16x512xf32>
    %c8 = arith.constant 8 : index
    %c0_33 = arith.constant 0 : index
    %c0_34 = arith.constant 0 : index
    %77 = vector.load %arg4[%c8, %c0_33, %c0_34] : memref<9x16x512xf32, #tpu.memory_space<vmem>>, vector<1x16x512xf32>
    %78 = vector.shape_cast %77 : vector<1x16x512xf32> to vector<16x512xf32>
    %79 = arith.mulf %76, %78 : vector<16x512xf32>
    %80 = arith.addf %75, %79 : vector<16x512xf32>
    %c0_35 = arith.constant 0 : index
    %c0_36 = arith.constant 0 : index
    %81 = vector.load %arg6[%c0_35, %c0_36] : memref<512x2xf32, #tpu.memory_space<vmem>>, vector<512x2xf32>
    %cst_37 = arith.constant dense<0.000000e+00> : vector<16x2xf32>
    %82 = tpu.matmul %80, %81, %cst_37 {dimension_numbers = #tpu.dot_dimension_numbers<[1], [0], [0], [1], [0, 0, 1, 1], [], []>} : vector<16x512xf32>, vector<512x2xf32>, vector<16x2xf32> -> vector<16x2xf32>
    %83 = arith.mulf %80, %80 : vector<16x512xf32>
    %c0_38 = arith.constant 0 : index
    %c0_39 = arith.constant 0 : index
    %84 = vector.load %arg6[%c0_38, %c0_39] : memref<512x2xf32, #tpu.memory_space<vmem>>, vector<512x2xf32>
    %cst_40 = arith.constant dense<0.000000e+00> : vector<16x2xf32>
    %85 = tpu.matmul %83, %84, %cst_40 {dimension_numbers = #tpu.dot_dimension_numbers<[1], [0], [0], [1], [0, 0, 1, 1], [], []>} : vector<16x512xf32>, vector<512x2xf32>, vector<16x2xf32> -> vector<16x2xf32>
    %cst_41 = arith.constant dense<0.000000e+00> : vector<16xf32>
    %86 = vector.multi_reduction <add>, %82, %cst_41 [1] : vector<16x2xf32> to vector<16xf32>
    %87 = vector.shape_cast %86 : vector<16xf32> to vector<16x1xf32>
    %cst_42 = arith.constant 0.001953125 : f32
    %88 = vector.broadcast %cst_42 : f32 to vector<16x1xf32>
    %89 = arith.mulf %87, %88 : vector<16x1xf32>
    %cst_43 = arith.constant dense<0.000000e+00> : vector<16xf32>
    %90 = vector.multi_reduction <add>, %85, %cst_43 [1] : vector<16x2xf32> to vector<16xf32>
    %91 = vector.shape_cast %90 : vector<16xf32> to vector<16x1xf32>
    %cst_44 = arith.constant 0.001953125 : f32
    %92 = vector.broadcast %cst_44 : f32 to vector<16x1xf32>
    %93 = arith.mulf %91, %92 : vector<16x1xf32>
    %c0_45 = arith.constant 0 : index
    %c0_46 = arith.constant 0 : index
    %94 = vector.load %arg7[%c0_45, %c0_46] : memref<16x1xf32, #tpu.memory_space<vmem>>, vector<16x1xf32>
    %95 = arith.mulf %89, %89 : vector<16x1xf32>
    %96 = arith.subf %93, %95 : vector<16x1xf32>
    %cst_47 = arith.constant 9.99999974E-6 : f32
    %97 = vector.broadcast %cst_47 : f32 to vector<16x1xf32>
    %98 = arith.addf %96, %97 : vector<16x1xf32>
    %99 = math.rsqrt %98 : vector<16x1xf32>
    %100 = arith.mulf %94, %99 : vector<16x1xf32>
    %c0_48 = arith.constant 0 : index
    %c0_49 = arith.constant 0 : index
    %101 = vector.load %arg8[%c0_48, %c0_49] : memref<16x1xf32, #tpu.memory_space<vmem>>, vector<16x1xf32>
    %102 = arith.mulf %89, %100 : vector<16x1xf32>
    %103 = arith.subf %101, %102 : vector<16x1xf32>
    %cst_50 = arith.constant 3.906250e-03 : f32
    %104 = vector.broadcast %cst_50 : f32 to vector<16x2xf32>
    %105 = arith.mulf %82, %104 : vector<16x2xf32>
    %106 = vector.broadcast %100 : vector<16x1xf32> to vector<16x2xf32>
    %107 = arith.mulf %105, %106 : vector<16x2xf32>
    %108 = vector.broadcast %103 : vector<16x1xf32> to vector<16x2xf32>
    %109 = arith.addf %107, %108 : vector<16x2xf32>
    %c0_51 = arith.constant 0 : index
    %c0_52 = arith.constant 0 : index
    %110 = vector.load %arg9[%c0_51, %c0_52] : memref<4x16xf32, #tpu.memory_space<vmem>>, vector<4x16xf32>
    %cst_53 = arith.constant dense<0.000000e+00> : vector<4x2xf32>
    %111 = tpu.matmul %110, %109, %cst_53 {dimension_numbers = #tpu.dot_dimension_numbers<[1], [0], [0], [1], [0, 0, 1, 1], [], []>} : vector<4x16xf32>, vector<16x2xf32>, vector<4x2xf32> -> vector<4x2xf32>
    %cst_54 = arith.constant 0.000000e+00 : f32
    %112 = vector.broadcast %cst_54 : f32 to vector<4x2xf32>
    %113 = arith.maximumf %111, %112 : vector<4x2xf32>
    %c0_55 = arith.constant 0 : index
    %c0_56 = arith.constant 0 : index
    %114 = vector.load %arg10[%c0_55, %c0_56] : memref<16x4xf32, #tpu.memory_space<vmem>>, vector<16x4xf32>
    %cst_57 = arith.constant dense<0.000000e+00> : vector<16x2xf32>
    %115 = tpu.matmul %114, %113, %cst_57 {dimension_numbers = #tpu.dot_dimension_numbers<[1], [0], [0], [1], [0, 0, 1, 1], [], []>} : vector<16x4xf32>, vector<4x2xf32>, vector<16x2xf32> -> vector<16x2xf32>
    %cst_58 = arith.constant 3.000000e+00 : f32
    %116 = vector.broadcast %cst_58 : f32 to vector<16x2xf32>
    %117 = arith.addf %115, %116 : vector<16x2xf32>
    %cst_59 = arith.constant 0.000000e+00 : f32
    %cst_60 = arith.constant 6.000000e+00 : f32
    %118 = vector.broadcast %cst_59 : f32 to vector<16x2xf32>
    %119 = arith.maximumf %118, %117 : vector<16x2xf32>
    %120 = vector.broadcast %cst_60 : f32 to vector<16x2xf32>
    %121 = arith.minimumf %120, %119 : vector<16x2xf32>
    %cst_61 = arith.constant 0.166666672 : f32
    %122 = vector.broadcast %cst_61 : f32 to vector<16x2xf32>
    %123 = arith.mulf %121, %122 : vector<16x2xf32>
    %124 = vector.broadcast %100 : vector<16x1xf32> to vector<16x2xf32>
    %125 = arith.mulf %124, %123 : vector<16x2xf32>
    %126 = vector.broadcast %103 : vector<16x1xf32> to vector<16x2xf32>
    %127 = arith.mulf %126, %123 : vector<16x2xf32>
    %c0_62 = arith.constant 0 : index
    %c0_63 = arith.constant 0 : index
    %128 = vector.load %arg5[%c0_62, %c0_63] : memref<2x512xf32, #tpu.memory_space<vmem>>, vector<2x512xf32>
    %cst_64 = arith.constant dense<0.000000e+00> : vector<16x512xf32>
    %129 = tpu.matmul %125, %128, %cst_64 {dimension_numbers = #tpu.dot_dimension_numbers<[1], [0], [0], [1], [0, 0, 1, 1], [], []>} : vector<16x2xf32>, vector<2x512xf32>, vector<16x512xf32> -> vector<16x512xf32>
    %c0_65 = arith.constant 0 : index
    %c0_66 = arith.constant 0 : index
    %130 = vector.load %arg5[%c0_65, %c0_66] : memref<2x512xf32, #tpu.memory_space<vmem>>, vector<2x512xf32>
    %cst_67 = arith.constant dense<0.000000e+00> : vector<16x512xf32>
    %131 = tpu.matmul %127, %130, %cst_67 {dimension_numbers = #tpu.dot_dimension_numbers<[1], [0], [0], [1], [0, 0, 1, 1], [], []>} : vector<16x2xf32>, vector<2x512xf32>, vector<16x512xf32> -> vector<16x512xf32>
    %132 = arith.mulf %80, %129 : vector<16x512xf32>
    %133 = arith.addf %132, %131 : vector<16x512xf32>
    %cst_68 = arith.constant 3.000000e+00 : f32
    %134 = vector.broadcast %cst_68 : f32 to vector<16x512xf32>
    %135 = arith.addf %133, %134 : vector<16x512xf32>
    %cst_69 = arith.constant 0.000000e+00 : f32
    %cst_70 = arith.constant 6.000000e+00 : f32
    %136 = vector.broadcast %cst_69 : f32 to vector<16x512xf32>
    %137 = arith.maximumf %136, %135 : vector<16x512xf32>
    %138 = vector.broadcast %cst_70 : f32 to vector<16x512xf32>
    %139 = arith.minimumf %138, %137 : vector<16x512xf32>
    %140 = arith.mulf %133, %139 : vector<16x512xf32>
    %cst_71 = arith.constant 0.166666672 : f32
    %141 = vector.broadcast %cst_71 : f32 to vector<16x512xf32>
    %142 = arith.mulf %140, %141 : vector<16x512xf32>
    %c0_72 = arith.constant 0 : index
    %c0_73 = arith.constant 0 : index
    %143 = vector.load %arg11[%c0_72, %c0_73] : memref<4x16xf32, #tpu.memory_space<vmem>>, vector<4x16xf32>
    %cst_74 = arith.constant dense<0.000000e+00> : vector<4x512xf32>
    %144 = tpu.matmul %143, %142, %cst_74 {dimension_numbers = #tpu.dot_dimension_numbers<[1], [0], [0], [1], [0, 0, 1, 1], [], []>} : vector<4x16xf32>, vector<16x512xf32>, vector<4x512xf32> -> vector<4x512xf32>
    %cst_75 = arith.constant dense<0.000000e+00> : vector<4xf32>
    %145 = vector.multi_reduction <add>, %144, %cst_75 [1] : vector<4x512xf32> to vector<4xf32>
    %146 = vector.shape_cast %145 : vector<4xf32> to vector<4x1xf32>
    %cst_76 = arith.constant 0.001953125 : f32
    %147 = vector.broadcast %cst_76 : f32 to vector<4x1xf32>
    %148 = arith.mulf %146, %147 : vector<4x1xf32>
    %149 = arith.mulf %144, %144 : vector<4x512xf32>
    %cst_77 = arith.constant dense<0.000000e+00> : vector<4xf32>
    %150 = vector.multi_reduction <add>, %149, %cst_77 [1] : vector<4x512xf32> to vector<4xf32>
    %151 = vector.shape_cast %150 : vector<4xf32> to vector<4x1xf32>
    %cst_78 = arith.constant 0.001953125 : f32
    %152 = vector.broadcast %cst_78 : f32 to vector<4x1xf32>
    %153 = arith.mulf %151, %152 : vector<4x1xf32>
    %c0_79 = arith.constant 0 : index
    %c0_80 = arith.constant 0 : index
    %154 = vector.load %arg12[%c0_79, %c0_80] : memref<4x1xf32, #tpu.memory_space<vmem>>, vector<4x1xf32>
    %155 = arith.mulf %148, %148 : vector<4x1xf32>
    %156 = arith.subf %153, %155 : vector<4x1xf32>
    %cst_81 = arith.constant 9.99999974E-6 : f32
    %157 = vector.broadcast %cst_81 : f32 to vector<4x1xf32>
    %158 = arith.addf %156, %157 : vector<4x1xf32>
    %159 = math.rsqrt %158 : vector<4x1xf32>
    %160 = arith.mulf %154, %159 : vector<4x1xf32>
    %c0_82 = arith.constant 0 : index
    %c0_83 = arith.constant 0 : index
    %161 = vector.load %arg13[%c0_82, %c0_83] : memref<4x1xf32, #tpu.memory_space<vmem>>, vector<4x1xf32>
    %162 = arith.mulf %148, %160 : vector<4x1xf32>
    %163 = arith.subf %161, %162 : vector<4x1xf32>
    %164 = vector.broadcast %160 : vector<4x1xf32> to vector<4x512xf32>
    %165 = arith.mulf %144, %164 : vector<4x512xf32>
    %166 = vector.broadcast %163 : vector<4x1xf32> to vector<4x512xf32>
    %167 = arith.addf %165, %166 : vector<4x512xf32>
    %168 = arith.addf %167, %3 : vector<4x512xf32>
    %169 = vector.extract_strided_slice %168 {offsets = [0, 0], sizes = [4, 256], strides = [1, 1]} : vector<4x512xf32> to vector<4x256xf32>
    %170 = vector.extract_strided_slice %168 {offsets = [0, 256], sizes = [4, 256], strides = [1, 1]} : vector<4x512xf32> to vector<4x256xf32>
    %171 = tpu.concatenate %169, %170 in 0 : vector<4x256xf32>, vector<4x256xf32> -> vector<8x256xf32>
    %c0_84 = arith.constant 0 : index
    %c0_85 = arith.constant 0 : index
    %172 = vector.load %arg14[%c0_84, %c0_85] : memref<8x256xf32, #tpu.memory_space<vmem>>, vector<8x256xf32>
    tpu.vector_store %arg14[%c0_84, %c0_85], %171 {strides = array<i32>} : memref<8x256xf32, #tpu.memory_space<vmem>>, vector<8x256xf32>,
    return
  }
}

</mosaic_0001>

<bundles_post_ra>
// kernel: tpu_custom_call.1
= control target key start
LH: loop header
LB: loop body
LE: loop exit
PB: predicated region body
PF: predicated region fallthrough
CT: control target
= control target key end

     0   :  { %vm65_vm0 = vcmask 1043456   ;;  %vm58_vm1 = vcmask 31744   ;;  %v3833_v3 = vmov 0.0   ;;  %s3816_s0 = inlined_call_operand.vmem [shape: f32[8,256], index: 0, kind: input, shape index: {}]   ;;  %s3817_s1 = inlined_call_operand.vmem [shape: f32[16,4], index: 1, kind: input, shape index: {}]   ;;  %s3818_s2 = inlined_call_operand.vmem [shape: f32[16,1], index: 2, kind: input, shape index: {}]   ;;  %s3819_s3 = inlined_call_operand.vmem [shape: f32[16,1], index: 3, kind: input, shape index: {}]   ;;  %s3820_s4 = inlined_call_operand.vmem [shape: f32[9,16,512], index: 4, kind: input, shape index: {}]   ;;  %s3821_s5 = inlined_call_operand.vmem [shape: f32[2,512], index: 5, kind: input, shape index: {}]   ;;  %s3822_s6 = inlined_call_operand.vmem [shape: f32[512,2], index: 6, kind: input, shape index: {}]   ;;  %s3823_s7 = inlined_call_operand.vmem [shape: f32[16,1], index: 7, kind: input, shape index: {}]   ;;  %s3824_s8 = inlined_call_operand.vmem [shape: f32[16,1], index: 8, kind: input, shape index: {}]   ;;  %s3825_s9 = inlined_call_operand.vmem [shape: f32[4,16], index: 9, kind: input, shape index: {}]   ;;  %s3826_s10 = inlined_call_operand.vmem [shape: f32[16,4], index: 10, kind: input, shape index: {}]   ;;  %s3827_s11 = inlined_call_operand.vmem [shape: f32[4,16], index: 11, kind: input, shape index: {}]   ;;  %s3828_s12 = inlined_call_operand.vmem [shape: f32[4,1], index: 12, kind: input, shape index: {}]   ;;  %s3829_s13 = inlined_call_operand.vmem [shape: f32[4,1], index: 13, kind: input, shape index: {}]   ;;  %s3830_s14 = inlined_call_operand.hbm [shape: f32[8,256], index: 14, kind: output, shape index: {}]  }
   0x1   :  { %v2411_v0 = vld [vmem:[%s3816_s0 + $0x8] sm:$0xff]  ;;  %v2416_v1 = vld [vmem:[%s3816_s0] sm:$0xff]  ;;  %138 = vmatprep.mubr.f32.mxu0 %v3833_v3 }
   0x2   :  { %3887 = vst [vmem:[#allocation5_spill] sm:$0xff] %v2411_v0  ;;  %3888 = vst [vmem:[#allocation6_spill] sm:$0xff] %v2416_v1  ;;  %v56_v2 = vld [vmem:[%s3817_s1] sm:$0xff]  ;;  %2006 = vmatprep.subr.msk.mxu0 %vm65_vm0, %v2411_v0  ;;  %v3831_v4 = vrot.slane %v2411_v0, 4  ;;  %v3832_v5 = vrot.slane %v2416_v1, 4 }
   0x3   :  { %19 = vsyncpa [#allocation3], 0  ;;  %2007 = vmatpush1.msk.msra.mxu0 %vm65_vm0, %v2416_v1  ;;  %215 = vmatprep.mubr.f32.mxu1 %v3833_v3  ;;  %v57_v6 = vld [vmem:[%s3817_s1 + $0x8] sm:$0xff]  ;;  %v2321_v35 = vmov 0   ;;  %v260_v50 = vld [vmem:[%s3818_s2] sm:$0xff]  ;;  %s2324_s28 = smov 15  }
   0x4   :  { %2008 = vmatmul.mubr.msk.f32.vlgmr.msra.gmra.mxu0 %vm58_vm1, %v56_v2  ;;  %2010 = vmatprep.subr.msk.mxu1 %vm65_vm0, %v3831_v4  ;;  %v272_v53 = vld [vmem:[%s3819_s3] sm:$0xff]  ;;  %v261_v54 = vld [vmem:[%s3818_s2 + $0x8] sm:$0xff]  ;;  %s2322_s2 = smov 16   ;;  %s2325_s29 = smov 1   ;;  %v2899_v4 = vld [vmem:[%s3822_s6 + $0x98] sm:$0xff]  ;;  %vm1144_vm10 = vcmask 15360  }
   0x5   :  { %2011 = vmatpush1.msk.msra.mxu1 %vm65_vm0, %v3832_v5  ;;  %144 = vmatprep.mubr.f32.mxu0 %v3833_v3  ;;  %v273_v60 = vld [vmem:[%s3819_s3 + $0x8] sm:$0xff]  ;;  %s2323_s3 = smov 17   ;;  %s2326_s30 = smov 127   ;;  %3921 = vst [vmem:[#allocation39_spill] sm:$0xff] %v2899_v4  ;;  %v2904_v5 = vld [vmem:[%s3822_s6 + $0x118] sm:$0xff]  ;;  %vm2330_vm11 = vmmov 0  }
   0x6   :  { %2012 = vmatmul.mubr.msk.f32.vlgmr.msra.gmra.mxu1 %vm58_vm1, %v56_v2  ;;  %2283 = vset.pattern.permute.xlu0 %v2321_v35  ;;  %s2327_s24 = smov 113   ;;  %s2328_s27 = smov 112   ;;  %3922 = vst [vmem:[#allocation40_spill] sm:$0xff] %v2904_v5  ;;  %v2913_v1 = vld [vmem:[%s3822_s6 + $0x18] sm:$0xff]  ;;  %vm1206_vm12 = vcmask 130048   ;;  %vm1402_vm13 = vcmask 1041408  }
   0x7   :  { %221 = vmatprep.mubr.f32.mxu1 %v3833_v3  ;;  %2284 = vset.pattern.permute.xlu1 %v2321_v35  ;;  %s2329_s15 = smov 111   ;;  %3923 = vst [vmem:[#allocation41_spill] sm:$0xff] %v2913_v1 }
   0x8   :  { %2009 = vmatmul.mubr.msk.f32.gmra.mxu0 %vm58_vm1, %v57_v6 }
   0xa   :  { %2013 = vmatmul.mubr.msk.f32.gmra.mxu1 %vm58_vm1, %v57_v6 }
  0xc4   :  { %v2444_v7 = vpop.f32.mrf.mxu0 }
  0xc5   :  { %v240_v10 = vmul.f32 %v2444_v7, %v2444_v7 }
  0xc6   :  { %v2446_v8 = vpop.f32.mrf.mxu0  ;;  %v2448_v9 = vpop.f32.mrf.mxu1 }
  0xc7   :  { %v228_v11 = vadd.f32 %v2446_v8, %v2444_v7  ;;  %v241_v12 = vmul.f32 %v2446_v8, %v2446_v8  ;;  %v242_v13 = vmul.f32 %v2448_v9, %v2448_v9 }
  0xc8   :  { %v2458_v14 = vpop.f32.mrf.mxu1  ;;  %v2460_v15 = vpop.f32.mrf.mxu0 }
  0xc9   :  { %v244_v16 = vmul.f32 %v2460_v15, %v2460_v15  ;;  %v229_v17 = vadd.f32 %v228_v11, %v2448_v9  ;;  %v248_v18 = vadd.f32 %v241_v12, %v240_v10  ;;  %v243_v27 = vmul.f32 %v2458_v14, %v2458_v14 }
  0xca   :  { %v2465_v19 = vpop.f32.mrf.mxu0  ;;  %v2467_v20 = vpop.f32.mrf.mxu1 }
  0xcb   :  { %v230_v21 = vadd.f32 %v229_v17, %v2458_v14  ;;  %v233_v22 = vadd.f32 %v2465_v19, %v2460_v15  ;;  %v245_v23 = vmul.f32 %v2465_v19, %v2465_v19  ;;  %v246_v24 = vmul.f32 %v2467_v20, %v2467_v20 }
  0xcc   :  { %v249_v25 = vadd.f32 %v248_v18, %v242_v13  ;;  %v2476_v26 = vpop.f32.mrf.mxu1 }
  0xcd   :  { %231 = vadd.xlane.f32.xlu0 %v230_v21  ;;  %v234_v28 = vadd.f32 %v233_v22, %v2467_v20  ;;  %v247_v29 = vmul.f32 %v2476_v26, %v2476_v26  ;;  %v253_v30 = vadd.f32 %v245_v23, %v244_v16 }
  0xce   :  { %v250_v31 = vadd.f32 %v249_v25, %v243_v27 }
  0xcf   :  { %v235_v32 = vadd.f32 %v234_v28, %v2476_v26  ;;  %v254_v33 = vadd.f32 %v253_v30, %v246_v24 }
  0xd1   :  { %251 = vadd.xlane.f32.xlu0 %v250_v31  ;;  %236 = vadd.xlane.f32.xlu1 %v235_v32  ;;  %v255_v34 = vadd.f32 %v254_v33, %v247_v29 }
  0xd5   :  { %256 = vadd.xlane.f32.xlu1 %v255_v34 }
 0x156   :  { %v232_v36 = vpop.xlane.xlu0 %231 }
 0x157   :  { %v238_v37 = vmul.f32 0.001953125, %v232_v36 }
 0x159   :  { %v262_v40 = vmul.f32 %v238_v37, %v238_v37 }
 0x15a   :  { %v252_v38 = vpop.xlane.xlu0 %251  ;;  %v237_v39 = vpop.xlane.xlu1 %236 }
 0x15b   :  { %v258_v41 = vmul.f32 0.001953125, %v252_v38  ;;  %v239_v42 = vmul.f32 0.001953125, %v237_v39  ;;  %v2545_v38 = vld [vmem:[%s3822_s6 + $0x1f8] sm:$0xff] }
 0x15c   :  { %2138 = vmatprep.subr.mxu1 %v2545_v38  ;;  %v2551_v39 = vld [vmem:[%s3822_s6 + $0xf8] sm:$0xff] }
 0x15d   :  { %v264_v43 = vsub.f32 %v258_v41, %v262_v40  ;;  %v263_v44 = vmul.f32 %v239_v42, %v239_v42  ;;  %v2556_v40 = vld [vmem:[%s3822_s6 + $0x178] sm:$0xff]  ;;  %2100 = vmatprep.subr.mxu0 %v2551_v39 }
 0x15e   :  { %v257_v45 = vpop.xlane.xlu1 %256  ;;  %v2561_v41 = vld [vmem:[%s3822_s6 + $0x78] sm:$0xff]  ;;  %2139 = vmatpush3.msra.mxu1 %v2556_v40 }
 0x15f   :  { %v266_v46 = vadd.f32 1e-05, %v264_v43  ;;  %v259_v47 = vmul.f32 0.001953125, %v257_v45  ;;  %v2570_v43 = vld [vmem:[%s3822_s6 + $0x1f0] sm:$0xff]  ;;  %2101 = vmatpush3.msra.mxu0 %v2561_v41 }
 0x160   :  { %v2581_v45 = vld [vmem:[%s3822_s6 + $0xf0] sm:$0xff]  ;;  %2140 = vmatprep.subr.mxu1 %v2570_v43 }
 0x161   :  { %2286 = vrsqrt.f32 %v266_v46  ;;  %v265_v48 = vsub.f32 %v259_v47, %v263_v44  ;;  %v2586_v46 = vld [vmem:[%s3822_s6 + $0x170] sm:$0xff]  ;;  %v2598_v47 = vld [vmem:[%s3822_s6 + $0x1e8] sm:$0xff]  ;;  %2102 = vmatprep.subr.mxu0 %v2581_v45 }
 0x162   :  { %2141 = vmatpush3.msra.mxu1 %v2586_v46 }
 0x163   :  { %v267_v49 = vadd.f32 1e-05, %v265_v48  ;;  %2142 = vmatprep.subr.mxu1 %v2598_v47 }
 0x165   :  { %2288 = vrsqrt.f32 %v267_v49  ;;  %v2608_v49 = vld [vmem:[%s3822_s6 + $0xe8] sm:$0xff] }
 0x16e   :  { %v2287_v51 = vpop.eup %2286 }
 0x16f   :  { %v270_v52 = vmul.f32 %v2287_v51, %v260_v50  ;;  %v2613_v50 = vld [vmem:[%s3822_s6 + $0x168] sm:$0xff] }
 0x170   :  { %v2620_v51 = vld [vmem:[%s3822_s6 + $0x68] sm:$0xff]  ;;  %2143 = vmatpush3.msra.mxu1 %v2613_v50 }
 0x171   :  { %280 = vperm.xlu0 %2283, %v270_v52   ;;  %v274_v55 = vmul.f32 %v270_v52, %v238_v37  ;;  %v2625_v52 = vld [vmem:[%s3822_s6 + $0x1e0] sm:$0xff] }
 0x172   :  { %v2289_v56 = vpop.eup %2288  ;;  %2144 = vmatprep.subr.mxu1 %v2625_v52 }
 0x173   :  { %v276_v57 = vsub.f32 %v272_v53, %v274_v55  ;;  %v271_v58 = vmul.f32 %v2289_v56, %v261_v54  ;;  %v2636_v54 = vld [vmem:[%s3822_s6 + $0xe0] sm:$0xff] }
 0x174   :  { %v2641_v55 = vld [vmem:[%s3822_s6 + $0x160] sm:$0xff] }
 0x175   :  { %298 = vperm.xlu1 %2284, %v276_v57   ;;  %v275_v59 = vmul.f32 %v271_v58, %v239_v42  ;;  %v2654_v57 = vld [vmem:[%s3822_s6 + $0x60] sm:$0xff]  ;;  %2145 = vmatpush3.msra.mxu1 %v2641_v55 }
 0x177   :  { %v277_v61 = vsub.f32 %v273_v60, %v275_v59  ;;  %v2666_v59 = vld [vmem:[%s3822_s6 + $0xd8] sm:$0xff] }
 0x178   :  { %v2671_v60 = vld [vmem:[%s3822_s6 + $0x158] sm:$0xff] }
 0x179   :  { %285 = vperm.xlu1 %2284, %v271_v58   ;;  %v2659_v58 = vld [vmem:[%s3822_s6 + $0x1d8] sm:$0xff] }
 0x17a   :  { %2146 = vmatprep.subr.mxu1 %v2659_v58 }
 0x17b   :  { %2147 = vmatpush3.msra.mxu1 %v2671_v60 }
 0x17d   :  { %303 = vperm.xlu1 %2284, %v277_v61   ;;  %v2680_v61 = vld [vmem:[%s3822_s6 + $0x58] sm:$0xff] }
 0x17e   :  { %3889 = vst [vmem:[#allocation7_spill] sm:$0xff] %v2680_v61 }
 0x1ec   :  { %v281_v62 = vpop.permute.xlu0 %280 }
 0x1ed   :  { %v288_v63 = vmul.f32 %v281_v62, %v2444_v7  ;;  %v289_v2 = vmul.f32 %v281_v62, %v2446_v8  ;;  %v290_v6 = vmul.f32 %v281_v62, %v2448_v9  ;;  %v291_v10 = vmul.f32 %v281_v62, %v2458_v14  ;;  %v2685_v62 = vld [vmem:[%s3822_s6 + $0x1d0] sm:$0xff] }
 0x1ee   :  { %3890 = vst [vmem:[#allocation8_spill] sm:$0xff] %v2685_v62  ;;  %2148 = vmatprep.subr.mxu1 %v2685_v62 }
 0x1f0   :  { %v299_v11 = vpop.permute.xlu1 %298 }
 0x1f1   :  { %v306_v12 = vadd.f32 %v299_v11, %v288_v63  ;;  %v307_v13 = vadd.f32 %v299_v11, %v289_v2  ;;  %v308_v16 = vadd.f32 %v299_v11, %v290_v6  ;;  %v309_v17 = vadd.f32 %v299_v11, %v291_v10  ;;  %v2695_v6 = vld [vmem:[%s3822_s6 + $0xd0] sm:$0xff] }
 0x1f2   :  { %3891 = vst [vmem:[#allocation9_spill] sm:$0xff] %v2695_v6  ;;  %v2700_v10 = vld [vmem:[%s3822_s6 + $0x150] sm:$0xff] }
 0x1f3   :  { %v314_v18 = vadd.f32 3.0, %v306_v12  ;;  %v315_v21 = vadd.f32 3.0, %v307_v13  ;;  %v316_v22 = vadd.f32 3.0, %v308_v16  ;;  %v317_v23 = vadd.f32 3.0, %v309_v17  ;;  %3892 = vst [vmem:[#allocation10_spill] sm:$0xff] %v2700_v10  ;;  %v2707_v11 = vld [vmem:[%s3822_s6 + $0x50] sm:$0xff]  ;;  %2149 = vmatpush3.msra.mxu1 %v2700_v10 }
 0x1f4   :  { %v2536_v37 = vpop.permute.xlu1 %285  ;;  %3893 = vst [vmem:[#allocation11_spill] sm:$0xff] %v2707_v11 }
 0x1f5   :  { %v322_v24 = vmax.f32 %v314_v18, 0.0  ;;  %v323_v25 = vmax.f32 %v315_v21, 0.0  ;;  %v325_v27 = vmax.f32 %v317_v23, 0.0  ;;  %v324_v28 = vmax.f32 %v316_v22, 0.0  ;;  %v2735_v21 = vld [vmem:[%s3822_s6 + $0x48] sm:$0xff]  ;;  %v2740_v22 = vld [vmem:[%s3822_s6 + $0x1c0] sm:$0xff] }
 0x1f6   :  { %v293_v44 = vmul.f32 %v2536_v37, %v2465_v19  ;;  %v2593_v19 = vld [vmem:[%s3822_s6 + $0x70] sm:$0xff]  ;;  %v295_v53 = vmul.f32 %v2536_v37, %v2476_v26  ;;  %3897 = vst [vmem:[#allocation15_spill] sm:$0xff] %v2735_v21  ;;  %3898 = vst [vmem:[#allocation16_spill] sm:$0xff] %v2740_v22  ;;  %v2747_v23 = vld [vmem:[%s3822_s6 + $0xc0] sm:$0xff] }
 0x1f7   :  { %v330_v7 = vmin.f32 %v322_v24, 6.0  ;;  %v331_v29 = vmin.f32 %v323_v25, 6.0  ;;  %v333_v8 = vmin.f32 %v325_v27, 6.0  ;;  %v332_v31 = vmin.f32 %v324_v28, 6.0  ;;  %2103 = vmatpush3.msra.mxu0 %v2593_v19  ;;  %3899 = vst [vmem:[#allocation17_spill] sm:$0xff] %v2747_v23  ;;  %v2752_v24 = vld [vmem:[%s3822_s6 + $0x140] sm:$0xff] }
 0x1f8   :  { %v2563_v42 = vpop.permute.xlu1 %303  ;;  %2104 = vmatprep.subr.mxu0 %v2608_v49  ;;  %3900 = vst [vmem:[#allocation18_spill] sm:$0xff] %v2752_v24  ;;  %v292_v25 = vmul.f32 %v2536_v37, %v2460_v15  ;;  %v2763_v27 = vld [vmem:[%s3822_s6 + $0x40] sm:$0xff]  ;;  %v2768_v28 = vld [vmem:[%s3822_s6 + $0x1b8] sm:$0xff] }
 0x1f9   :  { %v338_v30 = vmul.f32 %v330_v7, %v306_v12  ;;  %v339_v9 = vmul.f32 %v331_v29, %v307_v13  ;;  %v341_v14 = vmul.f32 %v333_v8, %v309_v17  ;;  %v340_v34 = vmul.f32 %v332_v31, %v308_v16  ;;  %2105 = vmatpush3.msra.mxu0 %v2620_v51  ;;  %v2712_v12 = vld [vmem:[%s3822_s6 + $0x1c8] sm:$0xff]  ;;  %v2781_v8 = vld [vmem:[%s3822_s6 + $0xb8] sm:$0xff]  ;;  %v2798_v31 = vld [vmem:[%s3822_s6 + $0x1b0] sm:$0xff] }
 0x1fa   :  { %v2601_v48 = vadd.f32 %v2563_v42, %v293_v44  ;;  %v2646_v26 = vadd.f32 %v2563_v42, %v295_v53  ;;  %2106 = vmatprep.subr.mxu0 %v2636_v54  ;;  %3894 = vst [vmem:[#allocation12_spill] sm:$0xff] %v2712_v12  ;;  %v2721_v13 = vld [vmem:[%s3822_s6 + $0xc8] sm:$0xff]  ;;  %2150 = vmatprep.subr.mxu1 %v2712_v12  ;;  %3901 = vst [vmem:[#allocation19_spill] sm:$0xff] %v2763_v27  ;;  %v2814_v44 = vld [vmem:[%s3822_s6 + $0x130] sm:$0xff] }
 0x1fb   :  { %v2500_v32 = vmul.f32 0.16666667, %v338_v30  ;;  %v2502_v33 = vmul.f32 0.16666667, %v339_v9  ;;  %v2508_v35 = vmul.f32 0.16666667, %v341_v14  ;;  %2107 = vmatpush3.msra.mxu0 %v2654_v57  ;;  %v2773_v15 = vadd.f32 %v2563_v42, %v292_v25 }
 0x1fc   :  { %v2514_v36 = vmul.f32 0.16666667, %v340_v34  ;;  %v319_v56 = vadd.f32 3.0, %v2601_v48  ;;  %v321_v63 = vadd.f32 3.0, %v2646_v26  ;;  %2108 = vmatprep.subr.mxu0 %v2666_v59  ;;  %3895 = vst [vmem:[#allocation13_spill] sm:$0xff] %v2721_v13  ;;  %v2726_v16 = vld [vmem:[%s3822_s6 + $0x148] sm:$0xff]  ;;  %v294_v14 = vmul.f32 %v2536_v37, %v2467_v20 }
 0x1fd   :  { %426 = vrot.lane.b32.xlu0 %v2502_v33, %s2322_s2  ;;  %371 = vrot.lane.b32.xlu1 %v2500_v32, %s2323_s3  ;;  %3896 = vst [vmem:[#allocation14_spill] sm:$0xff] %v2726_v16  ;;  %3902 = vst [vmem:[#allocation20_spill] sm:$0xff] %v2768_v28  ;;  %v2786_v30 = vld [vmem:[%s3822_s6 + $0x138] sm:$0xff]  ;;  %v2809_v34 = vld [vmem:[%s3822_s6 + $0xb0] sm:$0xff]  ;;  %v318_v37 = vadd.f32 3.0, %v2773_v15 }
 0x1fe   :  { %v327_v2 = vmax.f32 %v319_v56, 0.0  ;;  %2109 = vmatpush3.msra.mxu0 %v2680_v61  ;;  %v329_v17 = vmax.f32 %v321_v63, 0.0  ;;  %2151 = vmatpush3.msra.mxu1 %v2726_v16  ;;  %3903 = vst [vmem:[#allocation21_spill] sm:$0xff] %v2781_v8  ;;  %3904 = vst [vmem:[#allocation22_spill] sm:$0xff] %v2786_v30  ;;  %v2793_v9 = vld [vmem:[%s3822_s6 + $0x38] sm:$0xff]  ;;  %v2819_v20 = vadd.f32 %v2563_v42, %v294_v14  ;;  %v2830_v56 = vld [vmem:[%s3822_s6 + $0x30] sm:$0xff] }
 0x1ff   :  { %2110 = vmatprep.subr.mxu0 %v2695_v6  ;;  %2152 = vmatprep.subr.mxu1 %v2740_v22  ;;  %3905 = vst [vmem:[#allocation23_spill] sm:$0xff] %v2793_v9  ;;  %3906 = vst [vmem:[#allocation24_spill] sm:$0xff] %v2798_v31  ;;  %v2835_v42 = vld [vmem:[%s3822_s6 + $0x1a8] sm:$0xff]  ;;  %v326_v25 = vmax.f32 %v318_v37, 0.0  ;;  %v2878_v14 = vld [vmem:[%s3822_s6 + $0x120] sm:$0xff] }
 0x200   :  { %v335_v18 = vmin.f32 %v327_v2, 6.0  ;;  %2111 = vmatpush3.msra.mxu0 %v2707_v11  ;;  %v337_v7 = vmin.f32 %v329_v17, 6.0  ;;  %2153 = vmatpush3.msra.mxu1 %v2752_v24  ;;  %3907 = vst [vmem:[#allocation25_spill] sm:$0xff] %v2809_v34  ;;  %3908 = vst [vmem:[#allocation26_spill] sm:$0xff] %v2814_v44  ;;  %v2847_v63 = vld [vmem:[%s3822_s6 + $0x128] sm:$0xff]  ;;  %v2861_v17 = vld [vmem:[%s3822_s6 + $0x1a0] sm:$0xff] }
 0x201   :  { %434 = vrot.lane.b32.xlu0 %v2508_v35, %s2322_s2  ;;  %375 = vrot.lane.b32.xlu1 %v2502_v33, %s2323_s3  ;;  %3910 = vst [vmem:[#allocation28_spill] sm:$0xff] %v2830_v56  ;;  %3911 = vst [vmem:[#allocation29_spill] sm:$0xff] %v2835_v42  ;;  %v2856_v2 = vld [vmem:[%s3822_s6 + $0x28] sm:$0xff]  ;;  %v2885_v37 = vld [vmem:[%s3822_s6 + $0x20] sm:$0xff]  ;;  %v334_v0 = vmin.f32 %v326_v25, 6.0 }
 0x202   :  { %2112 = vmatprep.subr.mxu0 %v2721_v13  ;;  %v343_v29 = vmul.f32 %v335_v18, %v2601_v48  ;;  %2154 = vmatprep.subr.mxu1 %v2768_v28  ;;  %v345_v48 = vmul.f32 %v337_v7, %v2646_v26  ;;  %v2842_v26 = vld [vmem:[%s3822_s6 + $0xa8] sm:$0xff]  ;;  %3913 = vst [vmem:[#allocation31_spill] sm:$0xff] %v2847_v63  ;;  %3914 = vst [vmem:[#allocation32_spill] sm:$0xff] %v2856_v2  ;;  %v320_v18 = vadd.f32 3.0, %v2819_v20  ;;  %v2930_v25 = vld [vmem:[%s3822_s6 + $0x110] sm:$0xff] }
 0x203   :  { %2113 = vmatpush3.msra.mxu0 %v2735_v21  ;;  %2155 = vmatpush3.msra.mxu1 %v2786_v30  ;;  %3912 = vst [vmem:[#allocation30_spill] sm:$0xff] %v2842_v26  ;;  %3915 = vst [vmem:[#allocation33_spill] sm:$0xff] %v2861_v17  ;;  %v2014_v30 = vld [vmem:[%s3820_s4 + $0x100] sm:$0xff] }
 0x204   :  { %2114 = vmatprep.subr.mxu0 %v2747_v23  ;;  %v2823_v53 = vmul.f32 0.16666667, %v343_v29  ;;  %2156 = vmatprep.subr.mxu1 %v2798_v31  ;;  %v2866_v7 = vmul.f32 0.16666667, %v345_v48  ;;  %v2873_v29 = vld [vmem:[%s3822_s6 + $0xa0] sm:$0xff]  ;;  %3918 = vst [vmem:[#allocation36_spill] sm:$0xff] %v2878_v14  ;;  %v363_v10 = vmul.f32 %v2014_v30, %v2500_v32 }
 0x205   :  { %476 = vrot.lane.b32.xlu0 %v2502_v33, %s2324_s28  ;;  %379 = vrot.lane.b32.xlu1 %v2514_v36, %s2323_s3  ;;  %3917 = vst [vmem:[#allocation35_spill] sm:$0xff] %v2873_v29  ;;  %3919 = vst [vmem:[#allocation37_spill] sm:$0xff] %v2885_v37  ;;  %v2890_v48 = vld [vmem:[%s3822_s6 + $0x198] sm:$0xff]  ;;  %v328_v3 = vmax.f32 %v320_v18, 0.0  ;;  %v2925_v18 = vld [vmem:[%s3822_s6 + $0x90] sm:$0xff] }
 0x206   :  { %2115 = vmatpush3.msra.mxu0 %v2763_v27  ;;  %3909 = vst [vmem:[#allocation27_spill] sm:$0xff] %v2823_v53  ;;  %2157 = vmatpush3.msra.mxu1 %v2814_v44  ;;  %3916 = vst [vmem:[#allocation34_spill] sm:$0xff] %v2866_v7  ;;  %v399_v31 = vld [vmem:[%s3820_s4 + $0x8] sm:$0xff]  ;;  %v2017_v27 = vld [vmem:[%s3820_s4 + $0x118] sm:$0xff] }
 0x207   :  { %2116 = vmatprep.subr.mxu0 %v2781_v8  ;;  %2158 = vmatprep.subr.mxu1 %v2835_v42  ;;  %3920 = vst [vmem:[#allocation38_spill] sm:$0xff] %v2890_v48  ;;  %3925 = vst [vmem:[#allocation43_spill] sm:$0xff] %v2925_v18  ;;  %v400_v8 = vld [vmem:[%s3820_s4 + $0x10] sm:$0xff]  ;;  %v398_v24 = vld [vmem:[%s3820_s4] sm:$0xff] }
 0x208   :  { %2117 = vmatpush3.msra.mxu0 %v2793_v9  ;;  %2159 = vmatpush3.msra.mxu1 %v2847_v63  ;;  %3926 = vst [vmem:[#allocation44_spill] sm:$0xff] %v2930_v25  ;;  %v2016_v9 = vld [vmem:[%s3820_s4 + $0x110] sm:$0xff] }
 0x209   :  { %484 = vrot.lane.b32.xlu0 %v2508_v35, %s2324_s28  ;;  %383 = vrot.lane.b32.xlu1 %v2508_v35, %s2323_s3  ;;  %v365_v11 = vmul.f32 %v2016_v9, %v2514_v36 }
 0x20a   :  { %2118 = vmatprep.subr.mxu0 %v2809_v34  ;;  %2160 = vmatprep.subr.mxu1 %v2861_v17  ;;  %v2918_v17 = vld [vmem:[%s3822_s6 + $0x190] sm:$0xff]  ;;  %v2015_v34 = vld [vmem:[%s3820_s4 + $0x108] sm:$0xff] }
 0x20b   :  { %2119 = vmatpush3.msra.mxu0 %v2830_v56  ;;  %2161 = vmatpush3.msra.mxu1 %v2878_v14  ;;  %3924 = vst [vmem:[#allocation42_spill] sm:$0xff] %v2918_v17  ;;  %v2954_v14 = vld [vmem:[%s3822_s6 + $0x88] sm:$0xff]  ;;  %v364_v16 = vmul.f32 %v2015_v34, %v2502_v33  ;;  %v366_v34 = vmul.f32 %v2017_v27, %v2508_v35 }
 0x20c   :  { %2120 = vmatprep.subr.mxu0 %v2842_v26  ;;  %2162 = vmatprep.subr.mxu1 %v2890_v48  ;;  %v336_v48 = vmin.f32 %v328_v3, 6.0  ;;  %3929 = vst [vmem:[#allocation47_spill] sm:$0xff] %v2954_v14  ;;  %v2971_v3 = vld [vmem:[%s3822_s6 + $0x180] sm:$0xff] }
 0x20d   :  { %526 = vrot.lane.b32.xlu0 %v2502_v33, %s2325_s29  ;;  %422 = vrot.lane.b32.xlu1 %v2500_v32, %s2322_s2  ;;  %3932 = vst [vmem:[#allocation50_spill] sm:$0xff] %v2971_v3 }
 0x20e   :  { %2121 = vmatpush3.msra.mxu0 %v2856_v2  ;;  %2163 = vmatpush3.msra.mxu1 %v2904_v5  ;;  %v2939_v5 = vld [vmem:[%s3822_s6 + $0x10] sm:$0xff]  ;;  %v3869_v2 = vlaneseq }
 0x20f   :  { %2122 = vmatprep.subr.mxu0 %v2873_v29  ;;  %3927 = vst [vmem:[#allocation45_spill] sm:$0xff] %v2939_v5  ;;  %2164 = vmatprep.subr.mxu1 %v2918_v17  ;;  %v2959_v29 = vld [vmem:[%s3822_s6 + $0x108] sm:$0xff] }
 0x210   :  { %2123 = vmatpush3.msra.mxu0 %v2885_v37  ;;  %v342_v37 = vmul.f32 %v334_v0, %v2773_v15  ;;  %2165 = vmatpush3.msra.mxu1 %v2930_v25  ;;  %3930 = vst [vmem:[#allocation48_spill] sm:$0xff] %v2959_v29  ;;  %v2966_v0 = vld [vmem:[%s3822_s6 + $0x8] sm:$0xff]  ;;  %v2980_v15 = vld [vmem:[%s3822_s6 + $0x80] sm:$0xff]  ;;  %v3085_v26 = vand.u32 127, %v3869_v2 }
 0x211   :  { %534 = vrot.lane.b32.xlu0 %v2508_v35, %s2325_s29  ;;  %430 = vrot.lane.b32.xlu1 %v2514_v36, %s2322_s2  ;;  %3931 = vst [vmem:[#allocation49_spill] sm:$0xff] %v2966_v0  ;;  %3933 = vst [vmem:[#allocation51_spill] sm:$0xff] %v2980_v15 }
 0x212   :  { %2124 = vmatprep.subr.mxu0 %v2899_v4  ;;  %v2944_v4 = vld [vmem:[%s3822_s6 + $0x188] sm:$0xff]  ;;  %v2990_v25 = vmul.f32 0.16666667, %v342_v37  ;;  %vm389_vm2 = vcmp.lt.s32.totalorder %v3085_v26, 17  ;;  %vm438_vm3 = vcmp.lt.s32.totalorder %v3085_v26, 16  ;;  %vm488_vm4 = vcmp.lt.s32.totalorder %v3085_v26, 15 }
 0x213   :  { %3928 = vst [vmem:[#allocation46_spill] sm:$0xff] %v2944_v4  ;;  %2125 = vmatpush3.msra.mxu0 %v2913_v1  ;;  %2166 = vmatprep.subr.mxu1 %v2944_v4  ;;  %v2985_v4 = vld [vmem:[%s3822_s6 + $0x100] sm:$0xff]  ;;  %vm538_vm5 = vcmp.lt.s32.totalorder %v3085_v26, 1  ;;  %vm588_vm6 = vcmp.lt.s32.totalorder %v3085_v26, 127  ;;  %vm638_vm7 = vcmp.lt.s32.totalorder %v3085_v26, 113  ;;  %vm688_vm8 = vcmp.lt.s32.totalorder %v3085_v26, 112 }
 0x214   :  { %2126 = vmatprep.subr.mxu0 %v2925_v18  ;;  %3934 = vst [vmem:[#allocation52_spill] sm:$0xff] %v2985_v4  ;;  %2167 = vmatpush3.msra.mxu1 %v2959_v29  ;;  %3935 = vst [vmem:[#allocation53_spill] sm:$0xff] %v2990_v25  ;;  %v2997_v18 = vld [vmem:[%s3822_s6] sm:$0xff]  ;;  %vm738_vm9 = vcmp.lt.s32.totalorder %v3085_v26, 111 }
 0x215   :  { %576 = vrot.lane.b32.xlu0 %v2502_v33, %s2326_s30  ;;  %472 = vrot.lane.b32.xlu1 %v2500_v32, %s2324_s28  ;;  %3936 = vst [vmem:[#allocation54_spill] sm:$0xff] %v2997_v18 }
 0x216   :  { %2127 = vmatpush3.msra.mxu0 %v2939_v5  ;;  %v344_v5 = vmul.f32 %v336_v48, %v2819_v20  ;;  %2168 = vmatprep.subr.mxu1 %v2971_v3 }
 0x217   :  { %2128 = vmatprep.subr.mxu0 %v2954_v14  ;;  %2169 = vmatpush3.msra.mxu1 %v2985_v4 }
 0x218   :  { %2129 = vmatpush3.msra.mxu0 %v2966_v0  ;;  %2214 = vmatprep.subr.mxu1 %v2545_v38  ;;  %v3007_v20 = vmul.f32 0.16666667, %v344_v5 }
 0x219   :  { %584 = vrot.lane.b32.xlu0 %v2508_v35, %s2326_s30  ;;  %480 = vrot.lane.b32.xlu1 %v2514_v36, %s2324_s28 }
 0x21a   :  { %2130 = vmatprep.subr.mxu0 %v2980_v15  ;;  %3937 = vst [vmem:[#allocation55_spill] sm:$0xff] %v3007_v20 }
 0x21b   :  { %2131 = vmatpush3.msra.mxu0 %v2997_v18 }
 0x21c   :  { %2176 = vmatprep.subr.mxu0 %v2551_v39 }
 0x21d   :  { %626 = vrot.lane.b32.xlu0 %v2502_v33, %s2327_s24  ;;  %522 = vrot.lane.b32.xlu1 %v2500_v32, %s2325_s29 }
 0x221   :  { %634 = vrot.lane.b32.xlu0 %v2508_v35, %s2327_s24  ;;  %530 = vrot.lane.b32.xlu1 %v2514_v36, %s2325_s29 }
 0x225   :  { %676 = vrot.lane.b32.xlu0 %v2502_v33, %s2328_s27  ;;  %572 = vrot.lane.b32.xlu1 %v2500_v32, %s2326_s30 }
 0x229   :  { %684 = vrot.lane.b32.xlu0 %v2508_v35, %s2328_s27  ;;  %580 = vrot.lane.b32.xlu1 %v2514_v36, %s2326_s30 }
 0x22d   :  { %726 = vrot.lane.b32.xlu0 %v2502_v33, %s2329_s15  ;;  %622 = vrot.lane.b32.xlu1 %v2500_v32, %s2327_s24 }
 0x231   :  { %734 = vrot.lane.b32.xlu0 %v2508_v35, %s2329_s15  ;;  %630 = vrot.lane.b32.xlu1 %v2514_v36, %s2327_s24 }
 0x235   :  { %672 = vrot.lane.b32.xlu1 %v2500_v32, %s2328_s27  ;;  %377 = vrot.lane.b32.xlu0 %v2823_v53, %s2323_s3 }
 0x239   :  { %680 = vrot.lane.b32.xlu1 %v2514_v36, %s2328_s27  ;;  %385 = vrot.lane.b32.xlu0 %v2866_v7, %s2323_s3 }
 0x23d   :  { %722 = vrot.lane.b32.xlu1 %v2500_v32, %s2329_s15  ;;  %428 = vrot.lane.b32.xlu0 %v2823_v53, %s2322_s2  ;;  %v2023_v32 = vld [vmem:[%s3820_s4 + $0x48] sm:$0xff] }
 0x241   :  { %730 = vrot.lane.b32.xlu1 %v2514_v36, %s2329_s15  ;;  %436 = vrot.lane.b32.xlu0 %v2866_v7, %s2322_s2 }
 0x245   :  { %478 = vrot.lane.b32.xlu0 %v2823_v53, %s2324_s28  ;;  %373 = vrot.lane.b32.xlu1 %v2990_v25, %s2323_s3 }
 0x249   :  { %486 = vrot.lane.b32.xlu0 %v2866_v7, %s2324_s28  ;;  %381 = vrot.lane.b32.xlu1 %v3007_v20, %s2323_s3 }
 0x24d   :  { %528 = vrot.lane.b32.xlu0 %v2823_v53, %s2325_s29  ;;  %424 = vrot.lane.b32.xlu1 %v2990_v25, %s2322_s2 }
 0x251   :  { %536 = vrot.lane.b32.xlu0 %v2866_v7, %s2325_s29  ;;  %432 = vrot.lane.b32.xlu1 %v3007_v20, %s2322_s2 }
 0x255   :  { %578 = vrot.lane.b32.xlu0 %v2823_v53, %s2326_s30  ;;  %474 = vrot.lane.b32.xlu1 %v2990_v25, %s2324_s28 }
 0x259   :  { %586 = vrot.lane.b32.xlu0 %v2866_v7, %s2326_s30  ;;  %482 = vrot.lane.b32.xlu1 %v3007_v20, %s2324_s28 }
 0x25d   :  { %628 = vrot.lane.b32.xlu0 %v2823_v53, %s2327_s24  ;;  %524 = vrot.lane.b32.xlu1 %v2990_v25, %s2325_s29 }
 0x261   :  { %636 = vrot.lane.b32.xlu0 %v2866_v7, %s2327_s24  ;;  %532 = vrot.lane.b32.xlu1 %v3007_v20, %s2325_s29 }
 0x265   :  { %678 = vrot.lane.b32.xlu0 %v2823_v53, %s2328_s27  ;;  %574 = vrot.lane.b32.xlu1 %v2990_v25, %s2326_s30 }
 0x269   :  { %686 = vrot.lane.b32.xlu0 %v2866_v7, %s2328_s27  ;;  %582 = vrot.lane.b32.xlu1 %v3007_v20, %s2326_s30 }
 0x26d   :  { %728 = vrot.lane.b32.xlu0 %v2823_v53, %s2329_s15  ;;  %624 = vrot.lane.b32.xlu1 %v2990_v25, %s2327_s24 }
 0x26f   :  { %v3050_v5 = vpop.permute.xlu0 %426  ;;  %v372_v38 = vpop.permute.xlu1 %371 }
 0x271   :  { %736 = vrot.lane.b32.xlu0 %v2866_v7, %s2329_s15  ;;  %632 = vrot.lane.b32.xlu1 %v3007_v20, %s2327_s24 }
 0x273   :  { %v435_v39 = vpop.permute.xlu0 %434  ;;  %v376_v37 = vpop.permute.xlu1 %375 }
 0x274   :  { %v394_v2 = vsel %vm389_vm2, %v372_v38, %v376_v37 }
 0x275   :  { %674 = vrot.lane.b32.xlu1 %v2990_v25, %s2328_s27  ;;  %v407_v12 = vmul.f32 %v399_v31, %v394_v2 }
 0x277   :  { %v3058_v48 = vpop.permute.xlu0 %476  ;;  %v380_v53 = vpop.permute.xlu1 %379 }
 0x278   :  { %v392_v28 = vsel %vm389_vm2, %v376_v37, %v380_v53  ;;  %v401_v37 = vld [vmem:[%s3820_s4 + $0x18] sm:$0xff] }
 0x279   :  { %682 = vrot.lane.b32.xlu1 %v3007_v20, %s2328_s27  ;;  %v408_v33 = vmul.f32 %v400_v8, %v392_v28  ;;  %v415_v28 = vadd.f32 %v407_v12, %v364_v16  ;;  %v2024_v8 = vld [vmem:[%s3820_s4 + $0x50] sm:$0xff] }
 0x27b   :  { %v3062_v18 = vpop.permute.xlu0 %484  ;;  %v384_v4 = vpop.permute.xlu1 %383 }
 0x27c   :  { %v396_v23 = vsel %vm389_vm2, %v384_v4, %v372_v38  ;;  %v390_v13 = vsel %vm389_vm2, %v380_v53, %v384_v4  ;;  %v2022_v38 = vld [vmem:[%s3820_s4 + $0x40] sm:$0xff]  ;;  %v2025_v4 = vld [vmem:[%s3820_s4 + $0x58] sm:$0xff]  ;;  %v416_v53 = vadd.f32 %v408_v33, %v365_v11  ;;  %v2031_v11 = vld [vmem:[%s3820_s4 + $0x88] sm:$0xff] }
 0x27d   :  { %724 = vrot.lane.b32.xlu1 %v2990_v25, %s2329_s15  ;;  %v406_v62 = vmul.f32 %v398_v24, %v396_v23  ;;  %v409_v9 = vmul.f32 %v401_v37, %v390_v13  ;;  %v2033_v13 = vld [vmem:[%s3820_s4 + $0x98] sm:$0xff] }
 0x27f   :  { %v3066_v7 = vpop.permute.xlu0 %526  ;;  %v423_v15 = vpop.permute.xlu1 %422  ;;  %v414_v2 = vadd.f32 %v406_v62, %v363_v10  ;;  %v417_v16 = vadd.f32 %v409_v9, %v366_v34  ;;  %v2049_v9 = vld [vmem:[%s3820_s4 + $0x158] sm:$0xff] }
 0x280   :  { %v445_v6 = vsel %vm438_vm3, %v435_v39, %v423_v15  ;;  %v443_v30 = vsel %vm438_vm3, %v423_v15, %v3050_v5 }
 0x281   :  { %732 = vrot.lane.b32.xlu1 %v3007_v20, %s2329_s15  ;;  %v456_v24 = vmul.f32 %v2022_v38, %v445_v6  ;;  %v457_v15 = vmul.f32 %v2023_v32, %v443_v30  ;;  %v2038_v32 = vld [vmem:[%s3820_s4 + $0xc0] sm:$0xff]  ;;  %v2039_v30 = vld [vmem:[%s3820_s4 + $0xc8] sm:$0xff] }
 0x283   :  { %v3070_v3 = vpop.permute.xlu0 %534  ;;  %v431_v0 = vpop.permute.xlu1 %430  ;;  %v464_v33 = vadd.f32 %v456_v24, %v414_v2 }
 0x284   :  { %v439_v36 = vsel %vm438_vm3, %v431_v0, %v435_v39  ;;  %v441_v6 = vsel %vm438_vm3, %v3050_v5, %v431_v0  ;;  %v2041_v39 = vld [vmem:[%s3820_s4 + $0xd8] sm:$0xff]  ;;  %v2030_v0 = vld [vmem:[%s3820_s4 + $0x80] sm:$0xff] }
 0x285   :  { %v459_v31 = vmul.f32 %v2025_v4, %v439_v36  ;;  %v458_v34 = vmul.f32 %v2024_v8, %v441_v6  ;;  %v2032_v4 = vld [vmem:[%s3820_s4 + $0x90] sm:$0xff] }
 0x286   :  { %v2040_v6 = vld [vmem:[%s3820_s4 + $0xd0] sm:$0xff] }
 0x287   :  { %v3072_v29 = vpop.permute.xlu0 %576  ;;  %v3074_v14 = vpop.permute.xlu1 %472 }
 0x288   :  { %v493_v62 = vsel %vm488_vm4, %v3074_v14, %v3058_v48  ;;  %v495_v10 = vsel %vm488_vm4, %v3062_v18, %v3074_v14 }
 0x289   :  { %v507_v8 = vmul.f32 %v2031_v11, %v493_v62 }
 0x28b   :  { %v3076_v17 = vpop.permute.xlu0 %584  ;;  %v3078_v1 = vpop.permute.xlu1 %480 }
 0x28c   :  { %v489_v27 = vsel %vm488_vm4, %v3078_v1, %v3062_v18  ;;  %v491_v36 = vsel %vm488_vm4, %v3058_v48, %v3078_v1  ;;  %v467_v18 = vadd.f32 %v459_v31, %v417_v16 }
 0x28d   :  { %v509_v5 = vmul.f32 %v2033_v13, %v489_v27  ;;  %v465_v13 = vadd.f32 %v457_v15, %v415_v28  ;;  %v506_v27 = vmul.f32 %v2030_v0, %v495_v10  ;;  %v508_v2 = vmul.f32 %v2032_v4, %v491_v36  ;;  %v2048_v10 = vld [vmem:[%s3820_s4 + $0x150] sm:$0xff] }
 0x28f   :  { %v3080_v63 = vpop.permute.xlu0 %626  ;;  %v3082_v25 = vpop.permute.xlu1 %522  ;;  %v517_v16 = vadd.f32 %v509_v5, %v467_v18  ;;  %v2065_v5 = vld [vmem:[%s3820_s4 + $0x1d8] sm:$0xff]  ;;  %v514_v4 = vadd.f32 %v506_v27, %v464_v33  ;;  %v515_v36 = vadd.f32 %v507_v8, %v465_v13  ;;  %v2046_v18 = vld [vmem:[%s3820_s4 + $0x140] sm:$0xff] }
 0x290   :  { %v543_v1 = vsel %vm538_vm5, %v3082_v25, %v3066_v7  ;;  %v545_v48 = vsel %vm538_vm5, %v3070_v3, %v3082_v25  ;;  %v2057_v25 = vld [vmem:[%s3820_s4 + $0x198] sm:$0xff] }
 0x291   :  { %v557_v0 = vmul.f32 %v2039_v30, %v543_v1 }
 0x293   :  { %v3087_v20 = vpop.permute.xlu0 %634  ;;  %v3089_v42 = vpop.permute.xlu1 %530  ;;  %v565_v27 = vadd.f32 %v557_v0, %v515_v36  ;;  %v2062_v0 = vld [vmem:[%s3820_s4 + $0x1c0] sm:$0xff] }
 0x294   :  { %v539_v12 = vsel %vm538_vm5, %v3089_v42, %v3070_v3  ;;  %v541_v31 = vsel %vm538_vm5, %v3066_v7, %v3089_v42  ;;  %v2047_v42 = vld [vmem:[%s3820_s4 + $0x148] sm:$0xff] }
 0x295   :  { %v559_v24 = vmul.f32 %v2041_v39, %v539_v12  ;;  %v466_v39 = vadd.f32 %v458_v34, %v416_v53  ;;  %v556_v12 = vmul.f32 %v2038_v32, %v545_v48  ;;  %v558_v11 = vmul.f32 %v2040_v6, %v541_v31  ;;  %v2055_v48 = vld [vmem:[%s3820_s4 + $0x188] sm:$0xff]  ;;  %v2054_v6 = vld [vmem:[%s3820_s4 + $0x180] sm:$0xff] }
 0x297   :  { %v3092_v56 = vpop.permute.xlu0 %676  ;;  %v3094_v44 = vpop.permute.xlu1 %572  ;;  %v567_v62 = vadd.f32 %v559_v24, %v517_v16  ;;  %v2056_v24 = vld [vmem:[%s3820_s4 + $0x190] sm:$0xff] }
 0x298   :  { %v595_v14 = vsel %vm588_vm6, %v3076_v17, %v3094_v44 }
 0x299   :  { %v609_v61 = vmul.f32 %v2049_v9, %v595_v14  ;;  %v516_v14 = vadd.f32 %v508_v2, %v466_v39 }
 0x29b   :  { %v3124_v22 = vpop.permute.xlu0 %684  ;;  %v3126_v21 = vpop.permute.xlu1 %580  ;;  %v566_v8 = vadd.f32 %v558_v11, %v516_v14  ;;  %v2071_v14 = vld [vmem:[%s3820_s4 + $0x208] sm:$0xff] }
 0x29c   :  { %v591_v7 = vsel %vm588_vm6, %v3072_v29, %v3126_v21  ;;  %v589_v53 = vsel %vm588_vm6, %v3126_v21, %v3076_v17  ;;  %v593_v21 = vsel %vm588_vm6, %v3094_v44, %v3072_v29  ;;  %v617_v17 = vadd.f32 %v609_v61, %v567_v62 }
 0x29d   :  { %v607_v32 = vmul.f32 %v2047_v42, %v591_v7  ;;  %v608_v33 = vmul.f32 %v2048_v10, %v589_v53  ;;  %v564_v29 = vadd.f32 %v556_v12, %v514_v4  ;;  %v606_v2 = vmul.f32 %v2046_v18, %v593_v21  ;;  %v2070_v4 = vld [vmem:[%s3820_s4 + $0x200] sm:$0xff]  ;;  %v2072_v18 = vld [vmem:[%s3820_s4 + $0x210] sm:$0xff] }
 0x29f   :  { %v3155_v35 = vpop.permute.xlu0 %726  ;;  %v3157_v23 = vpop.permute.xlu1 %622  ;;  %v616_v11 = vadd.f32 %v608_v33, %v566_v8  ;;  %v614_v36 = vadd.f32 %v606_v2, %v564_v29 }
 0x2a0   :  { %v645_v3 = vsel %vm638_vm7, %v3087_v20, %v3157_v23  ;;  %v643_v31 = vsel %vm638_vm7, %v3157_v23, %v3080_v63  ;;  %v615_v23 = vadd.f32 %v607_v32, %v565_v27 }
 0x2a1   :  { %v659_v9 = vmul.f32 %v2057_v25, %v645_v3  ;;  %v656_v62 = vmul.f32 %v2054_v6, %v643_v31 }
 0x2a3   :  { %v3196_v37 = vpop.permute.xlu0 %734  ;;  %v631_v38 = vpop.permute.xlu1 %630  ;;  %v667_v16 = vadd.f32 %v659_v9, %v617_v17 }
 0x2a4   :  { %v639_v13 = vsel %vm638_vm7, %v631_v38, %v3087_v20  ;;  %v641_v61 = vsel %vm638_vm7, %v3080_v63, %v631_v38  ;;  %v2063_v20 = vld [vmem:[%s3820_s4 + $0x1c8] sm:$0xff]  ;;  %v2064_v38 = vld [vmem:[%s3820_s4 + $0x1d0] sm:$0xff]  ;;  %v2073_v63 = vld [vmem:[%s3820_s4 + $0x218] sm:$0xff] }
 0x2a5   :  { %v657_v39 = vmul.f32 %v2055_v48, %v641_v61  ;;  %v658_v12 = vmul.f32 %v2056_v24, %v639_v13  ;;  %v664_v48 = vadd.f32 %v656_v62, %v614_v36  ;;  %v3957_v62 = vld [vmem:[#allocation26_spill] sm:$0xff]  ;;  %v3964_v36 = vld [vmem:[#allocation35_spill] sm:$0xff] }
 0x2a7   :  { %v3240_v28 = vpop.permute.xlu0 %377  ;;  %v673_v15 = vpop.permute.xlu1 %672  ;;  %v665_v21 = vadd.f32 %v657_v39, %v615_v23  ;;  %v666_v17 = vadd.f32 %v658_v12, %v616_v11  ;;  %v3952_v23 = vld [vmem:[#allocation21_spill] sm:$0xff]  ;;  %v3953_v39 = vld [vmem:[#allocation22_spill] sm:$0xff] }
 0x2a8   :  { %v695_v34 = vsel %vm688_vm8, %v3124_v22, %v673_v15  ;;  %v693_v42 = vsel %vm688_vm8, %v673_v15, %v3092_v56  ;;  %v3956_v11 = vld [vmem:[#allocation25_spill] sm:$0xff] }
 0x2a9   :  { %v709_v44 = vmul.f32 %v2065_v5, %v695_v34  ;;  %v706_v9 = vmul.f32 %v2062_v0, %v693_v42  ;;  %v3954_v42 = vld [vmem:[#allocation23_spill] sm:$0xff] }
 0x2ab   :  { %v3270_v30 = vpop.permute.xlu0 %385  ;;  %v681_v1 = vpop.permute.xlu1 %680  ;;  %v717_v10 = vadd.f32 %v709_v44, %v667_v16  ;;  %v714_v6 = vadd.f32 %v706_v9, %v664_v48  ;;  %v3965_v9 = vld [vmem:[#allocation36_spill] sm:$0xff] }
 0x2ac   :  { %v689_v25 = vsel %vm688_vm8, %v681_v1, %v3124_v22  ;;  %v691_v3 = vsel %vm688_vm8, %v3092_v56, %v681_v1 }
 0x2ad   :  { %v707_v5 = vmul.f32 %v2063_v20, %v691_v3  ;;  %v708_v34 = vmul.f32 %v2064_v38, %v689_v25  ;;  %v3950_v3 = vld [vmem:[#allocation19_spill] sm:$0xff] }
 0x2af   :  { %v3312_v22 = vpop.permute.xlu0 %428  ;;  %v723_v7 = vpop.permute.xlu1 %722  ;;  %v715_v44 = vadd.f32 %v707_v5, %v665_v21  ;;  %v716_v29 = vadd.f32 %v708_v34, %v666_v17  ;;  %v3960_v5 = vld [vmem:[#allocation30_spill] sm:$0xff]  ;;  %v3961_v34 = vld [vmem:[#allocation31_spill] sm:$0xff] }
 0x2b0   :  { %v745_v53 = vsel %vm738_vm9, %v3196_v37, %v723_v7  ;;  %v743_v56 = vsel %vm738_vm9, %v723_v7, %v3155_v35  ;;  %v3955_v7 = vld [vmem:[#allocation24_spill] sm:$0xff]  ;;  %v3967_v21 = vld [vmem:[#allocation38_spill] sm:$0xff]  ;;  %v3968_v17 = vld [vmem:[#allocation39_spill] sm:$0xff] }
 0x2b1   :  { %v759_v15 = vmul.f32 %v2073_v63, %v745_v53  ;;  %v756_v24 = vmul.f32 %v2070_v4, %v743_v56  ;;  %v3951_v63 = vld [vmem:[#allocation20_spill] sm:$0xff]  ;;  %v3959_v53 = vld [vmem:[#allocation29_spill] sm:$0xff] }
 0x2b2   :  { %v3962_v56 = vld [vmem:[#allocation32_spill] sm:$0xff] }
 0x2b3   :  { %v3329_v32 = vpop.permute.xlu0 %436  ;;  %v731_v1 = vpop.permute.xlu1 %730  ;;  %v3331_v33 = vadd.f32 %v759_v15, %v717_v10  ;;  %v3958_v10 = vld [vmem:[#allocation28_spill] sm:$0xff]  ;;  %v3963_v15 = vld [vmem:[#allocation33_spill] sm:$0xff] }
 0x2b4   :  { %v739_v13 = vsel %vm738_vm9, %v731_v1, %v3196_v37  ;;  %v741_v61 = vsel %vm738_vm9, %v3155_v35, %v731_v1  ;;  %v3348_v37 = vadd.f32 %v756_v24, %v714_v6  ;;  %v3969_v1 = vld [vmem:[#allocation40_spill] sm:$0xff]  ;;  %v3970_v24 = vld [vmem:[#allocation41_spill] sm:$0xff] }
 0x2b5   :  { %v757_v27 = vmul.f32 %v2071_v14, %v741_v61  ;;  %v758_v8 = vmul.f32 %v2072_v18, %v739_v13  ;;  %975 = vmatprep.mubr.f32.mxu1 %v3331_v33  ;;  %v3966_v18 = vld [vmem:[#allocation37_spill] sm:$0xff]  ;;  %v3971_v13 = vld [vmem:[#allocation42_spill] sm:$0xff]  ;;  %v3972_v61 = vld [vmem:[#allocation43_spill] sm:$0xff] }
 0x2b6   :  { %v3977_v6 = vld [vmem:[#allocation48_spill] sm:$0xff] }
 0x2b7   :  { %v3340_v31 = vadd.f32 %v758_v8, %v716_v29  ;;  %v3342_v2 = vpop.permute.xlu0 %478  ;;  %v3344_v16 = vpop.permute.xlu1 %373  ;;  %v3346_v20 = vadd.f32 %v757_v27, %v715_v44  ;;  %v3973_v44 = vld [vmem:[#allocation44_spill] sm:$0xff]  ;;  %v3974_v29 = vld [vmem:[#allocation45_spill] sm:$0xff]  ;;  %v3975_v27 = vld [vmem:[#allocation46_spill] sm:$0xff] }
 0x2b8   :  { %v3976_v8 = vld [vmem:[#allocation47_spill] sm:$0xff] }
 0x2b9   :  { %900 = vmatprep.mubr.f32.mxu0 %v3346_v20  ;;  %976 = vmatmul.mubr.f32.vlgmr.msra.gmra.mxu1 %v3340_v31  ;;  %v987_v26 = vmul.f32 %v3346_v20, %v3346_v20 }
 0x2ba   :  { %901 = vmatmul.mubr.f32.vlgmr.msra.gmra.mxu0 %v3348_v37  ;;  %2215 = vmatpush3.msra.mxu1 %v2556_v40 }
 0x2bb   :  { %v3354_v35 = vpop.permute.xlu0 %486  ;;  %v3356_v38 = vpop.permute.xlu1 %381  ;;  %2177 = vmatpush3.msra.mxu0 %v2561_v41  ;;  %2216 = vmatprep.subr.mxu1 %v2570_v43 }
 0x2bc   :  { %2178 = vmatprep.subr.mxu0 %v2581_v45  ;;  %2217 = vmatpush3.msra.mxu1 %v2586_v46  ;;  %v3938_v45 = vld [vmem:[#allocation7_spill] sm:$0xff]  ;;  %v3939_v46 = vld [vmem:[#allocation8_spill] sm:$0xff] }
 0x2bd   :  { %2179 = vmatpush3.msra.mxu0 %v2593_v19  ;;  %2218 = vmatprep.subr.mxu1 %v2598_v47  ;;  %v3940_v19 = vld [vmem:[#allocation9_spill] sm:$0xff]  ;;  %v3941_v47 = vld [vmem:[#allocation10_spill] sm:$0xff] }
 0x2be   :  { %2180 = vmatprep.subr.mxu0 %v2608_v49  ;;  %2219 = vmatpush3.msra.mxu1 %v2613_v50  ;;  %v3942_v49 = vld [vmem:[#allocation11_spill] sm:$0xff]  ;;  %v3943_v50 = vld [vmem:[#allocation12_spill] sm:$0xff] }
 0x2bf   :  { %v3366_v40 = vpop.permute.xlu0 %528  ;;  %v3368_v25 = vpop.permute.xlu1 %424  ;;  %2181 = vmatpush3.msra.mxu0 %v2620_v51  ;;  %2220 = vmatprep.subr.mxu1 %v2625_v52  ;;  %v3944_v51 = vld [vmem:[#allocation13_spill] sm:$0xff]  ;;  %v3945_v52 = vld [vmem:[#allocation14_spill] sm:$0xff] }
 0x2c0   :  { %2182 = vmatprep.subr.mxu0 %v2636_v54  ;;  %2221 = vmatpush3.msra.mxu1 %v2641_v55 }
 0x2c1   :  { %2183 = vmatpush3.msra.mxu0 %v2654_v57  ;;  %2222 = vmatprep.subr.mxu1 %v2659_v58  ;;  %v3946_v57 = vld [vmem:[#allocation15_spill] sm:$0xff]  ;;  %v3947_v58 = vld [vmem:[#allocation16_spill] sm:$0xff] }
 0x2c2   :  { %2184 = vmatprep.subr.mxu0 %v2666_v59  ;;  %2223 = vmatpush3.msra.mxu1 %v2671_v60  ;;  %v3948_v59 = vld [vmem:[#allocation17_spill] sm:$0xff]  ;;  %v3949_v60 = vld [vmem:[#allocation18_spill] sm:$0xff] }
 0x2c3   :  { %v3378_v41 = vpop.permute.xlu0 %536  ;;  %v3380_v43 = vpop.permute.xlu1 %432  ;;  %2185 = vmatpush3.msra.mxu0 %v3938_v45  ;;  %2224 = vmatprep.subr.mxu1 %v3939_v46 }
 0x2c4   :  { %2186 = vmatprep.subr.mxu0 %v3940_v19  ;;  %2225 = vmatpush3.msra.mxu1 %v3941_v47  ;;  %v3978_v19 = vld [vmem:[#allocation49_spill] sm:$0xff]  ;;  %v3979_v47 = vld [vmem:[#allocation50_spill] sm:$0xff] }
 0x2c5   :  { %2187 = vmatpush3.msra.mxu0 %v3942_v49  ;;  %2226 = vmatprep.subr.mxu1 %v3943_v50  ;;  %v3980_v49 = vld [vmem:[#allocation51_spill] sm:$0xff]  ;;  %v3981_v50 = vld [vmem:[#allocation52_spill] sm:$0xff] }
 0x2c6   :  { %2188 = vmatprep.subr.mxu0 %v3944_v51  ;;  %2227 = vmatpush3.msra.mxu1 %v3945_v52  ;;  %v3982_v51 = vld [vmem:[#allocation54_spill] sm:$0xff]  ;;  %v402_v52 = vld [vmem:[%s3820_s4 + $0x20] sm:$0xff] }
 0x2c7   :  { %v3390_v54 = vpop.permute.xlu0 %578  ;;  %v3392_v55 = vpop.permute.xlu1 %474  ;;  %2189 = vmatpush3.msra.mxu0 %v3946_v57  ;;  %2228 = vmatprep.subr.mxu1 %v3947_v58  ;;  %v397_v57 = vsel %vm389_vm2, %v3270_v30, %v3344_v16  ;;  %v3983_v58 = vmov 0.0  }
 0x2c8   :  { %2190 = vmatprep.subr.mxu0 %v3948_v59  ;;  %2229 = vmatpush3.msra.mxu1 %v3949_v60  ;;  %v403_v59 = vld [vmem:[%s3820_s4 + $0x28] sm:$0xff]  ;;  %v395_v60 = vsel %vm389_vm2, %v3344_v16, %v3240_v28  ;;  %v391_v16 = vsel %vm389_vm2, %v3356_v38, %v3270_v30 }
 0x2c9   :  { %2191 = vmatpush3.msra.mxu0 %v3950_v3  ;;  %2230 = vmatprep.subr.mxu1 %v3951_v63  ;;  %v404_v3 = vld [vmem:[%s3820_s4 + $0x30] sm:$0xff]  ;;  %v393_v63 = vsel %vm389_vm2, %v3240_v28, %v3356_v38  ;;  %v410_v28 = vmul.f32 %v402_v52, %v397_v57  ;;  %v411_v30 = vmul.f32 %v403_v59, %v395_v60  ;;  %v2021_v38 = vld [vmem:[%s3820_s4 + $0x138] sm:$0xff]  ;;  %v2034_v60 = vld [vmem:[%s3820_s4 + $0xa0] sm:$0xff] }
 0x2ca   :  { %2192 = vmatprep.subr.mxu0 %v3952_v23  ;;  %2231 = vmatpush3.msra.mxu1 %v3953_v39  ;;  %v2018_v39 = vld [vmem:[%s3820_s4 + $0x120] sm:$0xff]  ;;  %v2045_v52 = vld [vmem:[%s3820_s4 + $0xf8] sm:$0xff] }
 0x2cb   :  { %v3402_v12 = vpop.permute.xlu0 %586  ;;  %v3404_v0 = vpop.permute.xlu1 %482  ;;  %2193 = vmatpush3.msra.mxu0 %v3954_v42  ;;  %2232 = vmatprep.subr.mxu1 %v3955_v7  ;;  %v405_v42 = vld [vmem:[%s3820_s4 + $0x38] sm:$0xff]  ;;  %v2019_v7 = vld [vmem:[%s3820_s4 + $0x128] sm:$0xff] }
 0x2cc   :  { %2194 = vmatprep.subr.mxu0 %v3956_v11  ;;  %2233 = vmatpush3.msra.mxu1 %v3957_v62  ;;  %v2020_v11 = vld [vmem:[%s3820_s4 + $0x130] sm:$0xff]  ;;  %v2026_v62 = vld [vmem:[%s3820_s4 + $0x60] sm:$0xff] }
 0x2cd   :  { %2195 = vmatpush3.msra.mxu0 %v3958_v10  ;;  %2234 = vmatprep.subr.mxu1 %v3959_v53  ;;  %v446_v10 = vsel %vm438_vm3, %v3329_v32, %v3368_v25 }
 0x2ce   :  { %2196 = vmatprep.subr.mxu0 %v3960_v5  ;;  %2235 = vmatpush3.msra.mxu1 %v3961_v34  ;;  %v412_v5 = vmul.f32 %v404_v3, %v393_v63  ;;  %v2029_v34 = vld [vmem:[%s3820_s4 + $0x78] sm:$0xff]  ;;  %v496_v3 = vsel %vm488_vm4, %v3354_v35, %v3392_v55 }
 0x2cf   :  { %v3414_v4 = vpop.permute.xlu1 %524  ;;  %2197 = vmatpush3.msra.mxu0 %v3962_v56  ;;  %2236 = vmatprep.subr.mxu1 %v3963_v15  ;;  %v3420_v14 = vpop.permute.xlu0 %628  ;;  %v440_v56 = vsel %vm438_vm3, %v3380_v43, %v3329_v32  ;;  %v3984_v15 = vld [vmem:[#allocation53_spill] sm:$0xff]  ;;  %v2037_v32 = vld [vmem:[%s3820_s4 + $0xb8] sm:$0xff] }
 0x2d0   :  { %2198 = vmatprep.subr.mxu0 %v3964_v36  ;;  %2237 = vmatpush3.msra.mxu1 %v3965_v9  ;;  %v367_v36 = vmul.f32 %v2018_v39, %v3984_v15  ;;  %v413_v9 = vmul.f32 %v405_v42, %v391_v16  ;;  %v2044_v15 = vld [vmem:[%s3820_s4 + $0xf0] sm:$0xff] }
 0x2d1   :  { %2199 = vmatpush3.msra.mxu0 %v3966_v18  ;;  %2238 = vmatprep.subr.mxu1 %v3967_v21  ;;  %v2027_v18 = vld [vmem:[%s3820_s4 + $0x68] sm:$0xff]  ;;  %v444_v21 = vsel %vm438_vm3, %v3368_v25, %v3312_v22  ;;  %v2028_v25 = vld [vmem:[%s3820_s4 + $0x70] sm:$0xff] }
 0x2d2   :  { %2200 = vmatprep.subr.mxu0 %v3968_v17  ;;  %2239 = vmatpush3.msra.mxu1 %v3969_v1  ;;  %v3985_v1 = vld [vmem:[#allocation27_spill] sm:$0xff] }
 0x2d3   :  { %v3426_v48 = vpop.permute.xlu1 %532  ;;  %2201 = vmatpush3.msra.mxu0 %v3970_v24  ;;  %2240 = vmatprep.subr.mxu1 %v3971_v13  ;;  %v3436_v45 = vpop.permute.xlu0 %636  ;;  %v368_v24 = vmul.f32 %v2019_v7, %v3985_v1  ;;  %v3986_v13 = vld [vmem:[#allocation55_spill] sm:$0xff] }
 0x2d4   :  { %2202 = vmatprep.subr.mxu0 %v3972_v61  ;;  %2241 = vmatpush3.msra.mxu1 %v3973_v44  ;;  %v369_v61 = vmul.f32 %v2020_v11, %v3986_v13  ;;  %v460_v44 = vmul.f32 %v2026_v62, %v446_v10  ;;  %v540_v57 = vsel %vm538_vm5, %v3426_v48, %v3378_v41  ;;  %v2053_v62 = vld [vmem:[%s3820_s4 + $0x178] sm:$0xff]  ;;  %v2042_v10 = vld [vmem:[%s3820_s4 + $0xe0] sm:$0xff] }
 0x2d5   :  { %2203 = vmatpush3.msra.mxu0 %v3974_v29  ;;  %2242 = vmatprep.subr.mxu1 %v3975_v27  ;;  %v490_v29 = vsel %vm488_vm4, %v3404_v0, %v3354_v35  ;;  %v418_v27 = vadd.f32 %v410_v28, %v367_v36  ;;  %v2036_v28 = vld [vmem:[%s3820_s4 + $0xb0] sm:$0xff]  ;;  %v492_v11 = vsel %vm488_vm4, %v3342_v2, %v3404_v0 }
 0x2d6   :  { %2204 = vmatprep.subr.mxu0 %v3976_v8  ;;  %2243 = vmatpush3.msra.mxu1 %v3977_v6  ;;  %v3987_v8 = vld [vmem:[#allocation34_spill] sm:$0xff]  ;;  %v513_v63 = vmul.f32 %v2037_v32, %v490_v29  ;;  %v546_v0 = vsel %vm538_vm5, %v3378_v41, %v3414_v4  ;;  %v542_v36 = vsel %vm538_vm5, %v3366_v40, %v3426_v48  ;;  %v2052_v29 = vld [vmem:[%s3820_s4 + $0x170] sm:$0xff] }
 0x2d7   :  { %v3438_v46 = vpop.permute.xlu1 %574  ;;  %2205 = vmatpush3.msra.mxu0 %v3978_v19  ;;  %2244 = vmatprep.subr.mxu1 %v3979_v47  ;;  %v3492_v53 = vpop.permute.xlu0 %678  ;;  %v370_v6 = vmul.f32 %v2021_v38, %v3987_v8  ;;  %v442_v19 = vsel %vm438_vm3, %v3312_v22, %v3380_v43  ;;  %v463_v47 = vmul.f32 %v2029_v34, %v440_v56  ;;  %v2035_v22 = vld [vmem:[%s3820_s4 + $0xa8] sm:$0xff]  ;;  %v2061_v41 = vld [vmem:[%s3820_s4 + $0x1b8] sm:$0xff] }
 0x2d8   :  { %2206 = vmatprep.subr.mxu0 %v3980_v49  ;;  %2245 = vmatpush3.msra.mxu1 %v3981_v50  ;;  %v419_v49 = vadd.f32 %v411_v30, %v368_v24  ;;  %v420_v50 = vadd.f32 %v412_v5, %v369_v61  ;;  %v494_v43 = vsel %vm488_vm4, %v3392_v55, %v3342_v2  ;;  %v2043_v30 = vld [vmem:[%s3820_s4 + $0xe8] sm:$0xff] }
 0x2d9   :  { %2207 = vmatpush3.msra.mxu0 %v3982_v51  ;;  %v461_v51 = vmul.f32 %v2027_v18, %v444_v21  ;;  %v421_v59 = vadd.f32 %v413_v9, %v370_v6  ;;  %v468_v16 = vadd.f32 %v460_v44, %v418_v27  ;;  %v462_v7 = vmul.f32 %v2028_v25, %v442_v19  ;;  %v2069_v6 = vld [vmem:[%s3820_s4 + $0x1f8] sm:$0xff] }
 0x2da   :  { %2258 = vmatprep.subr.mxu0 %v3983_v58  ;;  %v596_v35 = vsel %vm588_vm6, %v3402_v12, %v3438_v46  ;;  %v544_v2 = vsel %vm538_vm5, %v3414_v4, %v3366_v40  ;;  %v563_v38 = vmul.f32 %v2045_v52, %v540_v57  ;;  %v510_v34 = vmul.f32 %v2034_v60, %v496_v3  ;;  %v2051_v40 = vld [vmem:[%s3820_s4 + $0x168] sm:$0xff] }
 0x2db   :  { %v3467_v23 = vpop.permute.xlu1 %582  ;;  %v687_v39 = vpop.permute.xlu0 %686  ;;  %v471_v55 = vadd.f32 %v463_v47, %v421_v59  ;;  %v469_v5 = vadd.f32 %v461_v51, %v419_v49  ;;  %v511_v56 = vmul.f32 %v2035_v22, %v494_v43  ;;  %v512_v9 = vmul.f32 %v2036_v28, %v492_v11  ;;  %v2050_v51 = vld [vmem:[%s3820_s4 + $0x160] sm:$0xff]  ;;  %v2059_v60 = vld [vmem:[%s3820_s4 + $0x1a8] sm:$0xff]  ;;  %v2060_v22 = vld [vmem:[%s3820_s4 + $0x1b0] sm:$0xff] }
 0x2dc   :  { %v613_v21 = vmul.f32 %v2053_v62, %v596_v35  ;;  %v470_v24 = vadd.f32 %v462_v7, %v420_v50  ;;  %v560_v13 = vmul.f32 %v2042_v10, %v546_v0  ;;  %v561_v61 = vmul.f32 %v2043_v30, %v544_v2  ;;  %v2058_v7 = vld [vmem:[%s3820_s4 + $0x1a0] sm:$0xff] }
 0x2dd   :  { %v521_v18 = vadd.f32 %v513_v63, %v471_v55  ;;  %v592_v48 = vsel %vm588_vm6, %v3390_v54, %v3467_v23  ;;  %v562_v44 = vmul.f32 %v2044_v15, %v542_v36  ;;  %v590_v27 = vsel %vm588_vm6, %v3467_v23, %v3402_v12  ;;  %v2066_v0 = vld [vmem:[%s3820_s4 + $0x1e0] sm:$0xff] }
 0x2de   :  { %v518_v19 = vadd.f32 %v510_v34, %v468_v16  ;;  %v519_v47 = vadd.f32 %v511_v56, %v469_v5  ;;  %v520_v50 = vadd.f32 %v512_v9, %v470_v24  ;;  %v594_v12 = vsel %vm588_vm6, %v3438_v46, %v3390_v54 }
 0x2df   :  { %v3512_v17 = vpop.permute.xlu1 %624  ;;  %v571_v32 = vadd.f32 %v563_v38, %v521_v18  ;;  %v729_v8 = vpop.permute.xlu0 %728  ;;  %v611_v52 = vmul.f32 %v2051_v40, %v592_v48  ;;  %v612_v59 = vmul.f32 %v2052_v29, %v590_v27  ;;  %v610_v11 = vmul.f32 %v2050_v51, %v594_v12  ;;  %v2074_v18 = vld [vmem:[%s3820_s4 + $0x220] sm:$0xff] }
 0x2e0   :  { %v646_v4 = vsel %vm638_vm7, %v3436_v45, %v3512_v17  ;;  %v568_v3 = vadd.f32 %v560_v13, %v518_v19  ;;  %v569_v63 = vadd.f32 %v561_v61, %v519_v47  ;;  %v570_v16 = vadd.f32 %v562_v44, %v520_v50 }
 0x2e1   :  { %v663_v49 = vmul.f32 %v2061_v41, %v646_v4  ;;  %v621_v23 = vadd.f32 %v613_v21, %v571_v32  ;;  %v644_v28 = vsel %vm638_vm7, %v3512_v17, %v3420_v14 }
 0x2e2   :  { %v619_v17 = vadd.f32 %v611_v52, %v569_v63  ;;  %v620_v5 = vadd.f32 %v612_v59, %v570_v16  ;;  %v660_v34 = vmul.f32 %v2058_v7, %v644_v28  ;;  %v618_v4 = vadd.f32 %v610_v11, %v568_v3 }
 0x2e3   :  { %v633_v42 = vpop.permute.xlu1 %632  ;;  %v671_v62 = vadd.f32 %v663_v49, %v621_v23  ;;  %v737_v10 = vpop.permute.xlu0 %736  ;;  %v989_v23 = vmul.f32 %v3331_v33, %v3331_v33  ;;  %v986_v52 = vmul.f32 %v3348_v37, %v3348_v37 }
 0x2e4   :  { %v640_v43 = vsel %vm638_vm7, %v633_v42, %v3436_v45  ;;  %v642_v54 = vsel %vm638_vm7, %v3420_v14, %v633_v42  ;;  %v2067_v45 = vld [vmem:[%s3820_s4 + $0x1e8] sm:$0xff]  ;;  %v2068_v42 = vld [vmem:[%s3820_s4 + $0x1f0] sm:$0xff]  ;;  %v2077_v14 = vld [vmem:[%s3820_s4 + $0x238] sm:$0xff]  ;;  %v668_v44 = vadd.f32 %v660_v34, %v618_v4 }
 0x2e5   :  { %v661_v30 = vmul.f32 %v2059_v60, %v642_v54  ;;  %v662_v2 = vmul.f32 %v2060_v22, %v640_v43 }
 0x2e7   :  { %v675_v1 = vpop.permute.xlu1 %674  ;;  %v669_v13 = vadd.f32 %v661_v30, %v619_v17  ;;  %v670_v61 = vadd.f32 %v662_v2, %v620_v5 }
 0x2e8   :  { %v696_v25 = vsel %vm688_vm8, %v687_v39, %v675_v1 }
 0x2e9   :  { %v713_v46 = vmul.f32 %v2069_v6, %v696_v25 }
 0x2eb   :  { %v683_v57 = vpop.permute.xlu1 %682  ;;  %v721_v56 = vadd.f32 %v713_v46, %v671_v62 }
 0x2ec   :  { %v690_v35 = vsel %vm688_vm8, %v683_v57, %v687_v39  ;;  %v692_v55 = vsel %vm688_vm8, %v3492_v53, %v683_v57  ;;  %v694_v39 = vsel %vm688_vm8, %v675_v1, %v3492_v53  ;;  %v2075_v53 = vld [vmem:[%s3820_s4 + $0x228] sm:$0xff]  ;;  %v2076_v1 = vld [vmem:[%s3820_s4 + $0x230] sm:$0xff] }
 0x2ed   :  { %v711_v36 = vmul.f32 %v2067_v45, %v692_v55  ;;  %v712_v9 = vmul.f32 %v2068_v42, %v690_v35  ;;  %v710_v24 = vmul.f32 %v2066_v0, %v694_v39 }
 0x2ef   :  { %v725_v38 = vpop.permute.xlu1 %724  ;;  %v719_v6 = vadd.f32 %v711_v36, %v669_v13  ;;  %v720_v25 = vadd.f32 %v712_v9, %v670_v61  ;;  %v718_v49 = vadd.f32 %v710_v24, %v668_v44 }
 0x2f0   :  { %v746_v15 = vsel %vm738_vm9, %v737_v10, %v725_v38  ;;  %v744_v21 = vsel %vm738_vm9, %v725_v38, %v729_v8 }
 0x2f1   :  { %v763_v41 = vmul.f32 %v2077_v14, %v746_v15  ;;  %v760_v32 = vmul.f32 %v2074_v18, %v744_v21 }
 0x2f3   :  { %v733_v40 = vpop.permute.xlu1 %732  ;;  %v3672_v48 = vadd.f32 %v763_v41, %v721_v56  ;;  %v3683_v12 = vadd.f32 %v760_v32, %v718_v49  ;;  %v1161_v49 = vld [vmem:[%s3823_s7] sm:$0xff] }
 0x2f4   :  { %v740_v29 = vsel %vm738_vm9, %v733_v40, %v737_v10  ;;  %v742_v27 = vsel %vm738_vm9, %v729_v8, %v733_v40  ;;  %v988_v8 = vmul.f32 %v3340_v31, %v3340_v31 }
 0x2f5   :  { %v761_v19 = vmul.f32 %v2075_v53, %v742_v27  ;;  %v762_v47 = vmul.f32 %v2076_v1, %v740_v29  ;;  %980 = vmatprep.mubr.f32.mxu1 %v3672_v48  ;;  %v993_v57 = vmul.f32 %v3672_v48, %v3672_v48  ;;  %v990_v22 = vmul.f32 %v3683_v12, %v3683_v12 }
 0x2f7   :  { %v3679_v50 = vadd.f32 %v761_v19, %v719_v6  ;;  %v3681_v51 = vadd.f32 %v762_v47, %v720_v25 }
 0x2f9   :  { %905 = vmatprep.mubr.f32.mxu0 %v3679_v50  ;;  %981 = vmatmul.mubr.f32.gmra.mxu1 %v3681_v51  ;;  %v991_v59 = vmul.f32 %v3679_v50, %v3679_v50  ;;  %v992_v60 = vmul.f32 %v3681_v51, %v3681_v51 }
 0x2fa   :  { %906 = vmatmul.mubr.f32.gmra.mxu0 %v3683_v12  ;;  %1133 = vmatprep.mubr.f32.mxu1 %v989_v23 }
 0x2fb   :  { %1058 = vmatprep.mubr.f32.mxu0 %v987_v26 }
 0x2fd   :  { %1134 = vmatmul.mubr.f32.vlgmr.msra.gmra.mxu1 %v988_v8  ;;  %v1162_v8 = vld [vmem:[%s3823_s7 + $0x8] sm:$0xff] }
 0x2fe   :  { %1059 = vmatmul.mubr.f32.vlgmr.msra.gmra.mxu0 %v986_v52  ;;  %1138 = vmatprep.mubr.f32.mxu1 %v993_v57 }
 0x2ff   :  { %1063 = vmatprep.mubr.f32.mxu0 %v991_v59 }
 0x301   :  { %1139 = vmatmul.mubr.f32.gmra.mxu1 %v992_v60  ;;  %v1174_v60 = vld [vmem:[%s3824_s8 + $0x8] sm:$0xff] }
 0x302   :  { %1064 = vmatmul.mubr.f32.gmra.mxu0 %v990_v22  ;;  %v1173_v22 = vld [vmem:[%s3824_s8] sm:$0xff] }
 0x303   :  { %2262 = vmatprep.mubr.msk.f32.mxu0 %vm2330_vm11, %v3983_v58 }
 0x379   :  { %v2170_v43 = vpop.f32.mrf.mxu1 }
 0x37a   :  { %v2132_v54 = vpop.f32.mrf.mxu0 }
 0x37b   :  { %v2171_v46 = vpop.f32.mrf.mxu1 }
 0x37c   :  { %v2172_v3 = vadd.f32 %v2171_v46, %v2170_v43  ;;  %v2133_v63 = vpop.f32.mrf.mxu0 }
 0x37d   :  { %v2134_v16 = vadd.f32 %v2133_v63, %v2132_v54 }
 0x37f   :  { %v3704_v7 = vadd.f32 %v2172_v3, %v2134_v16 }
 0x381   :  { %v1145_v28 = vsel %vm1144_vm10, %v3704_v7, 0.0 }
 0x382   :  { %1146 = vadd.xlane.f32.xlu0 %v1145_v28  ;;  %v1179_v28 = vmul.f32 0.00390625, %v3704_v7  ;;  %v1281_v7 = vld [vmem:[%s3826_s10] sm:$0xff] }
 0x383   :  { %2267 = vmatprep.mubr.msk.f32.mxu1 %vm58_vm1, %v1281_v7 }
 0x3b9   :  { %v2173_v11 = vpop.f32.mrf.mxu1 }
 0x3ba   :  { %v2135_v62 = vpop.f32.mrf.mxu0 }
 0x3bb   :  { %v2174_v45 = vpop.f32.mrf.mxu1 }
 0x3bc   :  { %v2175_v42 = vadd.f32 %v2174_v45, %v2173_v11  ;;  %v2136_v35 = vpop.f32.mrf.mxu0 }
 0x3bd   :  { %v2137_v55 = vadd.f32 %v2136_v35, %v2135_v62  ;;  %v2246_v14 = vpop.f32.mrf.mxu1 }
 0x3be   :  { %v2208_v17 = vpop.f32.mrf.mxu0 }
 0x3bf   :  { %v2247_v10 = vpop.f32.mrf.mxu1  ;;  %v983_v30 = vadd.f32 %v2175_v42, %v2137_v55 }
 0x3c0   :  { %v2248_v2 = vadd.f32 %v2247_v10, %v2246_v14  ;;  %v2209_v0 = vpop.f32.mrf.mxu0  ;;  %v1205_v14 = vld [vmem:[%s3825_s9] sm:$0xf] }
 0x3c1   :  { %v2210_v39 = vadd.f32 %v2209_v0, %v2208_v17  ;;  %v2249_v38 = vpop.f32.mrf.mxu1  ;;  %v1148_v5 = vsel %vm1144_vm10, %v983_v30, 0.0  ;;  %v1180_v16 = vmul.f32 0.00390625, %v983_v30  ;;  %v2331_v0 = vmov 1983009808  }
 0x3c2   :  { %v2211_v34 = vpop.f32.mrf.mxu0  ;;  %1149 = vadd.xlane.f32.xlu1 %v1148_v5  ;;  %v3988_v5 = vlaneseq }
 0x3c3   :  { %v2250_v56 = vpop.f32.mrf.mxu1  ;;  %v1136_v15 = vadd.f32 %v2248_v2, %v2210_v39  ;;  %v1282_v2 = vld [vmem:[%s3826_s10 + $0x8] sm:$0xff]  ;;  %v1381_v39 = vunpack.c.l.s4 %v2331_v0 }
 0x3c4   :  { %v2251_v36 = vadd.f32 %v2250_v56, %v2249_v38  ;;  %v2212_v9 = vpop.f32.mrf.mxu0  ;;  %v1377_v56 = vld [vmem:[%s3821_s5] sm:$0xff] }
 0x3c5   :  { %v2213_v18 = vadd.f32 %v2212_v9, %v2211_v34  ;;  %v1153_v21 = vsel %vm1144_vm10, %v1136_v15, 0.0  ;;  %v1382_v38 = vunpack.c.0.s8 %v1381_v39  ;;  %v1384_v34 = vshrl.u32 %v3988_v5, 7 }
 0x3c6   :  { %1154 = vadd.xlane.f32.xlu1 %v1153_v21 }
 0x3c7   :  { %v1141_v41 = vadd.f32 %v2251_v36, %v2213_v18  ;;  %v1385_v15 = vsub.s32 %v1382_v38, %v1384_v34  ;;  %v1379_v36 = vcombine.high %v1377_v56, %v1377_v56 }
 0x3c9   :  { %v1156_v4 = vsel %vm1144_vm10, %v1141_v41, 0.0  ;;  %v1386_v9 = vrot.slane %v1377_v56, %v1385_v15  ;;  %v1393_v18 = vrot.slane %v1379_v36, %v1385_v15 }
 0x3ca   :  { %1157 = vadd.xlane.f32.xlu0 %v1156_v4 }
 0x3cb   :  { %v1394_v21 = vcombine.high %v1386_v9, %v1386_v9  ;;  %v1395_v41 = vcombine.high %v1393_v18, %v1393_v18 }
 0x40b   :  { %v1147_v24 = vpop.xlane.xlu0 %1146 }
 0x40c   :  { %v1151_v1 = vmul.f32 0.001953125, %v1147_v24 }
 0x40e   :  { %v1163_v61 = vmul.f32 %v1151_v1, %v1151_v1 }
 0x44b   :  { %v1150_v53 = vpop.xlane.xlu1 %1149 }
 0x44c   :  { %v1152_v40 = vmul.f32 0.001953125, %v1150_v53 }
 0x44e   :  { %v1164_v27 = vmul.f32 %v1152_v40, %v1152_v40 }
 0x44f   :  { %v1155_v13 = vpop.xlane.xlu1 %1154 }
 0x450   :  { %v1159_v44 = vmul.f32 0.001953125, %v1155_v13 }
 0x452   :  { %v1165_v32 = vsub.f32 %v1159_v44, %v1163_v61 }
 0x453   :  { %v1158_v29 = vpop.xlane.xlu0 %1157 }
 0x454   :  { %v1167_v6 = vadd.f32 1e-05, %v1165_v32  ;;  %v1160_v25 = vmul.f32 0.001953125, %v1158_v29 }
 0x456   :  { %2290 = vrsqrt.f32 %v1167_v6  ;;  %v1166_v19 = vsub.f32 %v1160_v25, %v1164_v27 }
 0x458   :  { %v1168_v47 = vadd.f32 1e-05, %v1166_v19 }
 0x45a   :  { %2292 = vrsqrt.f32 %v1168_v47 }
 0x463   :  { %v2291_v23 = vpop.eup %2290 }
 0x464   :  { %v1171_v26 = vmul.f32 %v2291_v23, %v1161_v49 }
 0x466   :  { %1183 = vperm.xlu1 %2284, %v1171_v26   ;;  %v1175_v59 = vmul.f32 %v1171_v26, %v1151_v1 }
 0x467   :  { %v2293_v52 = vpop.eup %2292 }
 0x468   :  { %v1172_v57 = vmul.f32 %v2293_v52, %v1162_v8  ;;  %v1177_v46 = vsub.f32 %v1173_v22, %v1175_v59 }
 0x46a   :  { %1188 = vperm.xlu0 %2283, %v1172_v57   ;;  %v1176_v43 = vmul.f32 %v1172_v57, %v1152_v40 }
 0x46c   :  { %v1178_v54 = vsub.f32 %v1174_v60, %v1176_v43 }
 0x46e   :  { %1200 = vperm.xlu1 %2284, %v1178_v54   ;;  %1195 = vperm.xlu0 %2283, %v1177_v46  }
 0x4e1   :  { %v1184_v3 = vpop.permute.xlu1 %1183 }
 0x4e2   :  { %v1191_v42 = vmul.f32 %v1184_v3, %v1179_v28 }
 0x4e5   :  { %v1189_v63 = vpop.permute.xlu0 %1188 }
 0x4e6   :  { %v1192_v11 = vmul.f32 %v1189_v63, %v1180_v16 }
 0x4e9   :  { %v3725_v62 = vpop.permute.xlu1 %1200  ;;  %v1196_v45 = vpop.permute.xlu0 %1195 }
 0x4ea   :  { %v1204_v35 = vadd.f32 %v3725_v62, %v1192_v11  ;;  %v1203_v55 = vadd.f32 %v1196_v45, %v1191_v42 }
 0x4ec   :  { %2259 = vmatpush3.msra.mxu0 %v1204_v35 }
 0x4ed   :  { %2260 = vmatprep.subr.mxu0 %v3983_v58 }
 0x4ee   :  { %2261 = vmatpush3.msra.mxu0 %v1203_v55 }
 0x4ef   :  { %2263 = vmatmul.mubr.msk.f32.vlgmr.msra.gmra.mxu0 %vm1206_vm12, %v1205_v14  ;;  %2082 = vmatprep.subr.msk.mxu0 %vm1402_vm13, %v1394_v21 }
 0x4f0   :  { %1475 = vmatprep.mubr.f32.mxu0 %v3983_v58  ;;  %2083 = vmatpush1.msk.msra.mxu0 %vm1402_vm13, %v1386_v9 }
 0x4f1   :  { %2090 = vmatprep.subr.msk.mxu0 %vm1402_vm13, %v1394_v21 }
 0x5af   :  { %v1276_v17 = vpop.f32.mrf.mxu0 }
 0x5b0   :  { %v1280_v10 = vmax.f32 %v1276_v17, 0.0 }
 0x5b1   :  { %v2264_v30 = vpop.f32.mrf.mxu0 }
 0x5b2   :  { %2265 = vmatprep.subr.msk.mxu1 %vm65_vm0, %v1280_v10 }
 0x5b3   :  { %2266 = vmatpush3.msk.msra.mxu1 %vm65_vm0, %v1280_v10 }
 0x5b4   :  { %2268 = vmatmul.mubr.msk.f32.vlgmr.msra.gmra.mxu1 %vm58_vm1, %v1282_v2  ;;  %2086 = vmatprep.subr.msk.mxu1 %vm1402_vm13, %v1395_v41 }
 0x5b5   :  { %1552 = vmatprep.mubr.f32.mxu1 %v3983_v58  ;;  %2087 = vmatpush1.msk.msra.mxu1 %vm1402_vm13, %v1393_v18 }
 0x5b6   :  { %2094 = vmatprep.subr.msk.mxu1 %vm1402_vm13, %v1395_v41 }
 0x674   :  { %v2269_v4 = vpop.f32.mrf.mxu1 }
 0x675   :  { %v1364_v24 = vadd.f32 3.0, %v2269_v4 }
 0x676   :  { %v1358_v53 = vpop.f32.mrf.mxu1 }
 0x677   :  { %v1368_v1 = vmax.f32 %v1364_v24, 0.0  ;;  %v1359_v13 = vadd.f32 3.0, %v1358_v53 }
 0x679   :  { %v1367_v61 = vmax.f32 %v1359_v13, 0.0  ;;  %v1370_v40 = vmin.f32 %v1368_v1, 6.0 }
 0x67b   :  { %v1369_v44 = vmin.f32 %v1367_v61, 6.0  ;;  %v1372_v29 = vmul.f32 0.16666667, %v1370_v40 }
 0x67d   :  { %v1371_v32 = vmul.f32 0.16666667, %v1369_v44  ;;  %v1374_v6 = vmul.f32 %v1372_v29, %v1189_v63  ;;  %v1376_v19 = vmul.f32 %v1372_v29, %v3725_v62 }
 0x67f   :  { %v1373_v27 = vmul.f32 %v1371_v32, %v1184_v3  ;;  %v1375_v25 = vmul.f32 %v1371_v32, %v1196_v45 }
 0x681   :  { %2084 = vmatmul.mubr.msk.f32.vlgmr.msra.gmra.mxu0 %vm1144_vm10, %v1373_v27  ;;  %2088 = vmatmul.mubr.msk.f32.vlgmr.msra.gmra.mxu1 %vm1144_vm10, %v1373_v27 }
 0x682   :  { %1481 = vmatprep.mubr.f32.mxu0 %v3983_v58  ;;  %1558 = vmatprep.mubr.f32.mxu1 %v3983_v58 }
 0x683   :  { %2091 = vmatpush1.msk.msra.mxu0 %vm1402_vm13, %v1386_v9  ;;  %2095 = vmatpush1.msk.msra.mxu1 %vm1402_vm13, %v1393_v18 }
 0x685   :  { %2085 = vmatmul.mubr.msk.f32.gmra.mxu0 %vm1144_vm10, %v1374_v6  ;;  %2089 = vmatmul.mubr.msk.f32.gmra.mxu1 %vm1144_vm10, %v1374_v6 }
 0x686   :  { %1635 = vmatprep.mubr.f32.mxu0 %v3983_v58  ;;  %1712 = vmatprep.mubr.f32.mxu1 %v3983_v58 }
 0x689   :  { %2092 = vmatmul.mubr.msk.f32.vlgmr.msra.gmra.mxu0 %vm1144_vm10, %v1375_v25  ;;  %2096 = vmatmul.mubr.msk.f32.vlgmr.msra.gmra.mxu1 %vm1144_vm10, %v1375_v25 }
 0x68a   :  { %1641 = vmatprep.mubr.f32.mxu0 %v3983_v58  ;;  %1718 = vmatprep.mubr.f32.mxu1 %v3983_v58 }
 0x68d   :  { %2093 = vmatmul.mubr.msk.f32.gmra.mxu0 %vm1144_vm10, %v1376_v19  ;;  %2097 = vmatmul.mubr.msk.f32.gmra.mxu1 %vm1144_vm10, %v1376_v19 }
 0x68e   :  { %1849 = vmatprep.mubr.f32.mxu0 %v3983_v58  ;;  %1920 = vmatprep.mubr.f32.mxu1 %v3983_v58 }
 0x741   :  { %v1477_v47 = vpop.f32.mrf.mxu0  ;;  %v1554_v49 = vpop.f32.mrf.mxu1 }
 0x742   :  { %v1725_v60 = vmul.f32 %v1477_v47, %v3348_v37  ;;  %v1727_v22 = vmul.f32 %v1554_v49, %v3340_v31 }
 0x743   :  { %v1479_v23 = vpop.f32.mrf.mxu0  ;;  %v1556_v26 = vpop.f32.mrf.mxu1 }
 0x744   :  { %v1726_v46 = vmul.f32 %v1479_v23, %v3346_v20  ;;  %v1728_v3 = vmul.f32 %v1556_v26, %v3331_v33 }
 0x745   :  { %v1483_v8 = vpop.f32.mrf.mxu0  ;;  %v1560_v52 = vpop.f32.mrf.mxu1 }
 0x746   :  { %v1729_v45 = vmul.f32 %v1483_v8, %v3683_v12  ;;  %v1731_v42 = vmul.f32 %v1560_v52, %v3681_v51 }
 0x747   :  { %v1485_v57 = vpop.f32.mrf.mxu0  ;;  %v1562_v59 = vpop.f32.mrf.mxu1 }
 0x748   :  { %v1730_v20 = vmul.f32 %v1485_v57, %v3679_v50  ;;  %v1732_v33 = vmul.f32 %v1562_v59, %v3672_v48 }
 0x749   :  { %v1637_v43 = vpop.f32.mrf.mxu0  ;;  %v1714_v54 = vpop.f32.mrf.mxu1 }
 0x74a   :  { %v1733_v63 = vadd.f32 %v1725_v60, %v1637_v43  ;;  %v1735_v58 = vadd.f32 %v1727_v22, %v1714_v54  ;;  %v1781_v60 = vld [vmem:[%s3827_s11] sm:$0xf] }
 0x74b   :  { %v1639_v16 = vpop.f32.mrf.mxu0  ;;  %v1716_v28 = vpop.f32.mrf.mxu1 }
 0x74c   :  { %v1734_v11 = vadd.f32 %v1726_v46, %v1639_v16  ;;  %v1736_v62 = vadd.f32 %v1728_v3, %v1716_v28  ;;  %v1741_v55 = vadd.f32 3.0, %v1733_v63  ;;  %v1743_v31 = vadd.f32 3.0, %v1735_v58 }
 0x74d   :  { %v1643_v35 = vpop.f32.mrf.mxu0  ;;  %v1720_v37 = vpop.f32.mrf.mxu1 }
 0x74e   :  { %v1742_v14 = vadd.f32 3.0, %v1734_v11  ;;  %v1744_v7 = vadd.f32 3.0, %v1736_v62  ;;  %v1737_v17 = vadd.f32 %v1729_v45, %v1643_v35  ;;  %v1739_v10 = vadd.f32 %v1731_v42, %v1720_v37 }
 0x74f   :  { %v1645_v30 = vpop.f32.mrf.mxu0  ;;  %v1722_v2 = vpop.f32.mrf.mxu1  ;;  %v1749_v34 = vmax.f32 %v1741_v55, 0.0  ;;  %v1751_v56 = vmax.f32 %v1743_v31, 0.0 }
 0x750   :  { %v1750_v0 = vmax.f32 %v1742_v14, 0.0  ;;  %v1752_v39 = vmax.f32 %v1744_v7, 0.0  ;;  %v1745_v38 = vadd.f32 3.0, %v1737_v17  ;;  %v1747_v12 = vadd.f32 3.0, %v1739_v10 }
 0x751   :  { %v1738_v5 = vadd.f32 %v1730_v20, %v1645_v30  ;;  %v1740_v51 = vadd.f32 %v1732_v33, %v1722_v2  ;;  %v1757_v53 = vmin.f32 %v1749_v34, 6.0  ;;  %v1759_v1 = vmin.f32 %v1751_v56, 6.0  ;;  %v1957_v56 = vld [vmem:[%s3829_s13] sm:$0xf] }
 0x752   :  { %v1753_v15 = vmax.f32 %v1745_v38, 0.0  ;;  %v1755_v36 = vmax.f32 %v1747_v12, 0.0  ;;  %v1758_v21 = vmin.f32 %v1750_v0, 6.0  ;;  %v1760_v50 = vmin.f32 %v1752_v39, 6.0 }
 0x753   :  { %v1746_v9 = vadd.f32 3.0, %v1738_v5  ;;  %v1748_v18 = vadd.f32 3.0, %v1740_v51  ;;  %v1765_v25 = vmul.f32 %v1757_v53, %v1733_v63  ;;  %v1767_v19 = vmul.f32 %v1759_v1, %v1735_v58 }
 0x754   :  { %v1761_v41 = vmin.f32 %v1753_v15, 6.0  ;;  %v1763_v48 = vmin.f32 %v1755_v36, 6.0  ;;  %v1766_v32 = vmul.f32 %v1758_v21, %v1734_v11  ;;  %v1768_v29 = vmul.f32 %v1760_v50, %v1736_v62 }
 0x755   :  { %v1754_v4 = vmax.f32 %v1746_v9, 0.0  ;;  %v1756_v24 = vmax.f32 %v1748_v18, 0.0  ;;  %v1773_v57 = vmul.f32 0.16666667, %v1765_v25  ;;  %v1775_v59 = vmul.f32 0.16666667, %v1767_v19 }
 0x756   :  { %v1769_v40 = vmul.f32 %v1761_v41, %v1737_v17  ;;  %v1771_v44 = vmul.f32 %v1763_v48, %v1739_v10  ;;  %v1774_v8 = vmul.f32 0.16666667, %v1766_v32  ;;  %v1776_v52 = vmul.f32 0.16666667, %v1768_v29  ;;  %v2297_v25 = vld [vmem:[%s3816_s0 + $0x8] sm:$0xff] }
 0x757   :  { %v1762_v13 = vmin.f32 %v1754_v4, 6.0  ;;  %v1764_v61 = vmin.f32 %v1756_v24, 6.0 }
 0x758   :  { %v1777_v23 = vmul.f32 0.16666667, %v1769_v40  ;;  %v1779_v26 = vmul.f32 0.16666667, %v1771_v44  ;;  %v3991_v44 = vld [vmem:[#allocation5_spill] sm:$0xff] }
 0x759   :  { %v1770_v27 = vmul.f32 %v1762_v13, %v1738_v5  ;;  %v1772_v6 = vmul.f32 %v1764_v61, %v1740_v51  ;;  %v1951_v5 = vld [vmem:[%s3828_s12] sm:$0xf]  ;;  %v3989_v13 = vld [vmem:[#allocation6_spill] sm:$0xff]  ;;  %v3992_v32 = vrot.slane %v3991_v44, 4  ;;  %s2332_s12 = smov [#allocation2]  }
 0x75a   :  { %v3990_v61 = vrot.slane %v3989_v13, 4  ;;  %s1998_s13 = sshll.u32 %s2332_s12, 4  ;;  %s1999_s13 = int_to_ptr.vmem [resolvable:$true] %s1998_s13 }
 0x75b   :  { %v1778_v47 = vmul.f32 0.16666667, %v1770_v27  ;;  %v1780_v49 = vmul.f32 0.16666667, %v1772_v6  ;;  %v2296_v27 = vld [vmem:[%s3816_s0] sm:$0xff]  ;;  %s2298_s28 = scalar_lea.vmem %s1999_s13, 256  ;;  %p2303_p1 = scmp.lt.s32.totalorder %s1999_s13, %s1999_s13 }
 0x75c   :  { %p2299_p0 = scmp.ne.s32.totalorder %s1999_s13, %s2298_s28  ;;  %p2304_p2 = scmp.lt.s32.totalorder %s2298_s28, %s2298_s28 }
 0x75d   :  { %1813 = vmatprep.subr.mxu0 %v1778_v47  ;;  %1884 = vmatprep.subr.mxu1 %v1780_v49 }
 0x75e   :  { %1814 = vmatpush1.msra.mxu0 %v1777_v23  ;;  %1885 = vmatpush1.msra.mxu1 %v1779_v26  ;;  %p2305_p3 = por %p2304_p2, %p2303_p1 }
 0x75f   :  { %1815 = vmatprep.subr.mxu0 %v1774_v8  ;;  %1886 = vmatprep.subr.mxu1 %v1776_v52 }
 0x760   :  { %1816 = vmatpush1.msra.mxu0 %v1773_v57  ;;  %1887 = vmatpush1.msra.mxu1 %v1775_v59  ;;  %p2306_p4 = pnand %p2305_p3, %p2299_p0 }
 0x761   :  { %2098 = vmatmul.mubr.msk.f32.vlgmr.msra.gmra.mxu0 %vm1206_vm12, %v1781_v60  ;;  %2099 = vmatmul.mubr.msk.f32.vlgmr.msra.gmra.mxu1 %vm1206_vm12, %v1781_v60 }
 0x821   :  { %v1851_v22 = vpop.f32.mrf.mxu0  ;;  %v1922_v43 = vpop.f32.mrf.mxu1 }
 0x822   :  { %v1937_v54 = vmul.f32 %v1851_v22, %v1851_v22  ;;  %v1939_v46 = vmul.f32 %v1922_v43, %v1922_v43  ;;  %v1927_v58 = vsel %vm65_vm0, %v1851_v22, 0.0  ;;  %v1930_v11 = vsel %vm65_vm0, %v1922_v43, 0.0 }
 0x823   :  { %v1853_v3 = vpop.f32.mrf.mxu0  ;;  %v1924_v63 = vpop.f32.mrf.mxu1 }
 0x824   :  { %v1928_v16 = vsel %vm65_vm0, %v1853_v3, 0.0  ;;  %v1938_v28 = vmul.f32 %v1853_v3, %v1853_v3  ;;  %v1941_v45 = vsel %vm65_vm0, %v1937_v54, 0.0  ;;  %v1940_v35 = vmul.f32 %v1924_v63, %v1924_v63 }
 0x825   :  { %v1929_v62 = vadd.f32 %v1928_v16, %v1927_v58  ;;  %v1944_v37 = vsel %vm65_vm0, %v1939_v46, 0.0  ;;  %v1932_v14 = vsel %vm65_vm0, %v1924_v63, 0.0 }
 0x826   :  { %v1942_v42 = vsel %vm65_vm0, %v1938_v28, 0.0  ;;  %v1946_v33 = vsel %vm65_vm0, %v1940_v35, 0.0 }
 0x827   :  { %v1943_v55 = vadd.f32 %v1942_v42, %v1941_v45  ;;  %v1931_v31 = vadd.f32 %v1930_v11, %v1929_v62 }
 0x829   :  { %v1933_v7 = vadd.f32 %v1932_v14, %v1931_v31  ;;  %v1945_v20 = vadd.f32 %v1944_v37, %v1943_v55 }
 0x82b   :  { %1934 = vadd.xlane.f32.xlu1 %v1933_v7  ;;  %v1947_v17 = vadd.f32 %v1946_v33, %v1945_v20 }
 0x82d   :  { %1948 = vadd.xlane.f32.xlu0 %v1947_v17 }
 0x8b4   :  { %v1935_v10 = vpop.xlane.xlu1 %1934 }
 0x8b5   :  { %v1936_v30 = vmul.f32 0.001953125, %v1935_v10 }
 0x8b6   :  { %v1949_v2 = vpop.xlane.xlu0 %1948 }
 0x8b7   :  { %v1952_v0 = vmul.f32 %v1936_v30, %v1936_v30  ;;  %v1950_v39 = vmul.f32 0.001953125, %v1949_v2 }
 0x8b9   :  { %v1953_v38 = vsub.f32 %v1950_v39, %v1952_v0 }
 0x8bb   :  { %v1954_v12 = vadd.f32 1e-05, %v1953_v38 }
 0x8bd   :  { %2294 = vrsqrt.f32 %v1954_v12 }
 0x8ca   :  { %v2295_v51 = vpop.eup %2294 }
 0x8cb   :  { %v1956_v34 = vmul.f32 %v2295_v51, %v1951_v5 }
 0x8cd   :  { %1962 = vperm.xlu0 %2283, %v1956_v34   ;;  %v1958_v15 = vmul.f32 %v1956_v34, %v1936_v30 }
 0x8cf   :  { %v1959_v36 = vsub.f32 %v1957_v56, %v1958_v15 }
 0x8d1   :  { %1971 = vperm.xlu1 %2284, %v1959_v36  }
 0x948   :  { %v1963_v9 = vpop.permute.xlu0 %1962 }
 0x949   :  { %v1965_v18 = vmul.f32 %v1963_v9, %v1851_v22  ;;  %v1966_v21 = vmul.f32 %v1963_v9, %v1853_v3  ;;  %v1967_v50 = vmul.f32 %v1963_v9, %v1922_v43  ;;  %v1968_v41 = vmul.f32 %v1963_v9, %v1924_v63 }
 0x94c   :  { %v1972_v48 = vpop.permute.xlu1 %1971 }
 0x94d   :  { %v1974_v4 = vadd.f32 %v1972_v48, %v1965_v18  ;;  %v1975_v24 = vadd.f32 %v1972_v48, %v1966_v21  ;;  %v1976_v53 = vadd.f32 %v1972_v48, %v1967_v50  ;;  %v1977_v1 = vadd.f32 %v1972_v48, %v1968_v41 }
 0x94f   :  { %v1980_v40 = vadd.f32 %v1976_v53, %v3990_v61  ;;  %v1981_v29 = vadd.f32 %v1977_v1, %v3992_v32  ;;  %v1978_v6 = vadd.f32 %v2296_v27, %v1974_v4  ;;  %v1979_v19 = vadd.f32 %v2297_v25, %v1975_v24 }
 0x951   :  { %v1984_v47 = vrot.slane %v1980_v40, 4  ;;  %v1985_v49 = vrot.slane %v1981_v29, 4 }
 0x953   :  { %v1988_v23 = vsel %vm65_vm0, %v1978_v6, %v1984_v47  ;;  %v1989_v26 = vsel %vm65_vm0, %v1979_v19, %v1985_v49 }
 0x954   :  { %1990 = vst [vmem:[#allocation2] sm:$0xff] %v1988_v23  ;;  %1991 = vst [vmem:[#allocation2 + $0x8] sm:$0xff] %v1989_v26 }
 0x955   :  { %2309 = shalt.err (!%p2306_p4)
}
 0x956   :  { %2001 = dma.vmem_to_hbm [thread:$0]  %s1999_s13, 256, %s3830_s14, [#allocation3]  }
 0x957   :  { %2318 = dma.done.wait [#allocation3], 256  }
 0x958   :  { %2319 = vsyncadd [#allocation3], 4294967040 }
 0x959   :  { %2005 = vsyncpa [#allocation3], 1 }

</bundles_post_ra>
